<compile_context>
chip_gen: v7x
topology: tpu7x:2x2x1
jax: 0.10.0
libtpu: 0.0.40
codegen_flags: <defaults>
</compile_context>

<pallas_src>
import functools

import jax
import jax.numpy as jnp
from jax import lax
from jax.experimental import pallas as pl
from jax.experimental.pallas import tpu as pltpu

_LANE = 128
_SUBLANE = 8
_PAD_RHO = -20.0  # softplus(-20) ~ 2e-9: finite log(sigma), masked out of KL


def _round_up(n, m):
    return ((n + m - 1) // m) * m


def _stable_softplus(r):
    return jnp.maximum(r, 0.0) + jnp.log1p(jnp.exp(-jnp.abs(r)))


def fused_hbnn_kernel(in_sz_ref, out_sz_ref,          # SMEM (L,) int32 true sizes
                      x_ref,                           # (B, D) f32 layer-0 input
                      wmu_ref, wrho_ref, epsw_ref,     # (1, D, D) f32, layer l
                      bmu_ref, brho_ref, epsb_ref,     # (1, 1, D) f32, layer l
                      pmu_ref, plv_ref,                # (1, 1, 1) f32, layer l
                      y_ref, kl_ref,                   # outputs
                      act_ref, kl_acc_ref,             # VMEM scratch (persist)
                      *, matmul_dtype):
    l = pl.program_id(0)
    n_layers = pl.num_programs(0)

    @pl.when(l == 0)
    def _init():
        act_ref[...] = x_ref[...]
        kl_acc_ref[...] = jnp.zeros_like(kl_acc_ref)

    in_f = in_sz_ref[l]      # true fan-in  of this layer
    out_f = out_sz_ref[l]    # true fan-out of this layer

    wmu = wmu_ref[0]         # (D, D) in (in, out) layout
    wrho = wrho_ref[0]
    bmu = bmu_ref[0]         # (1, D)
    brho = brho_ref[0]
    prior_mu = pmu_ref[0]        # (1, 1)
    prior_logvar = plv_ref[0]    # (1, 1)

    # --- reparameterized sample (f32 elementwise) ---
    w_sigma = _stable_softplus(wrho)
    b_sigma = _stable_softplus(brho)
    w = wmu + w_sigma * epsw_ref[0]
    b = bmu + b_sigma * epsb_ref[0]

    # --- linear layer on the MXU (bf16 operands, f32 accumulation) ---
    x = act_ref[...]
    y = jnp.dot(x.astype(matmul_dtype), w.astype(matmul_dtype),
                preferred_element_type=jnp.float32) + b

    # zero padded output columns so the next layer's matmul ignores them
    col_y = lax.broadcasted_iota(jnp.int32, y.shape, 1)
    y = jnp.where(col_y < out_f, y, 0.0)
    act_ref[...] = y

    @pl.when(l < n_layers - 1)
    def _relu():
        act_ref[...] = jnp.maximum(act_ref[...], 0.0)

    @pl.when(l == n_layers - 1)
    def _emit_y():
        y_ref[...] = act_ref[...]

    # --- KL divergence vs. learned hierarchical normal prior ---
    prior_var = jnp.exp(prior_logvar)            # (1, 1)
    inv_2var = 0.5 * pl.reciprocal(prior_var)    # hoisted scalar, no per-elem div
    half_logvar = 0.5 * prior_logvar             # (1, 1)

    row_w = lax.broadcasted_iota(jnp.int32, wmu.shape, 0)
    col_w = lax.broadcasted_iota(jnp.int32, wmu.shape, 1)
    w_mask = (row_w < in_f) & (col_w < out_f)
    b_mask = lax.broadcasted_iota(jnp.int32, bmu.shape, 1) < out_f

    def kl_core(mu, sigma, mask):
        # per-element: (sigma^2 + (mu - prior_mu)^2)/(2 var) - log(sigma)
        t = (sigma * sigma + (mu - prior_mu) ** 2) * inv_2var - jnp.log(sigma)
        return jnp.sum(jnp.where(mask, t, 0.0), keepdims=True)   # (1, 1)

    n_w = (in_f * out_f).astype(jnp.float32)
    n_b = out_f.astype(jnp.float32)
    kl_layer = (kl_core(wmu, w_sigma, w_mask)
                + kl_core(bmu, b_sigma, b_mask)
                + (n_w + n_b) * (half_logvar - 0.5)      # hoisted constant terms
                + 0.5 * prior_mu * prior_mu
                + 0.5 * prior_logvar * prior_logvar)
    kl_acc_ref[...] += kl_layer

    @pl.when(l == n_layers - 1)
    def _emit_kl():
        kl_ref[...] = kl_acc_ref[...]


def init_layer_params(key, in_f, out_f):
    """Matches HierarchicalBayesianLinear.reset_parameters (PyTorch layout)."""
    k_w, k_b = jax.random.split(key)
    bound = 1.0 / (in_f ** 0.5)   # kaiming_uniform_(a=sqrt(5))
    return {
        "weight_mu": jax.random.uniform(k_w, (out_f, in_f), jnp.float32,
                                        minval=-bound, maxval=bound),
        "weight_rho": jnp.full((out_f, in_f), -5.0, jnp.float32),
        "bias_mu": jax.random.uniform(k_b, (out_f,), jnp.float32,
                                      minval=-0.1, maxval=0.1),
        "bias_rho": jnp.full((out_f,), -5.0, jnp.float32),
        "prior_mu": jnp.zeros((1,), jnp.float32),
        "prior_logvar": jnp.zeros((1,), jnp.float32),
    }


def pack_params(layer_params):
    """One-time packing: transpose to (in,out), pad to lane-dense D, stack layers."""
    dims = []
    for p in layer_params:
        out_f, in_f = p["weight_mu"].shape
        dims += [in_f, out_f]
    d_pad = _round_up(max(dims), _LANE)
    n_layers = len(layer_params)

    w_mu_t = jnp.zeros((n_layers, d_pad, d_pad), jnp.float32)
    w_rho_t = jnp.full((n_layers, d_pad, d_pad), _PAD_RHO, jnp.float32)
    b_mu = jnp.zeros((n_layers, 1, d_pad), jnp.float32)
    b_rho = jnp.full((n_layers, 1, d_pad), _PAD_RHO, jnp.float32)
    p_mu = jnp.zeros((n_layers, 1, 1), jnp.float32)
    p_lv = jnp.zeros((n_layers, 1, 1), jnp.float32)
    in_sizes, out_sizes = [], []
    for i, p in enumerate(layer_params):
        out_f, in_f = p["weight_mu"].shape
        w_mu_t = w_mu_t.at[i, :in_f, :out_f].set(p["weight_mu"].T)
        w_rho_t = w_rho_t.at[i, :in_f, :out_f].set(p["weight_rho"].T)
        b_mu = b_mu.at[i, 0, :out_f].set(p["bias_mu"])
        b_rho = b_rho.at[i, 0, :out_f].set(p["bias_rho"])
        p_mu = p_mu.at[i, 0, 0].set(p["prior_mu"][0])
        p_lv = p_lv.at[i, 0, 0].set(p["prior_logvar"][0])
        in_sizes.append(in_f)
        out_sizes.append(out_f)

    packed = {
        "w_mu_t": w_mu_t, "w_rho_t": w_rho_t,
        "b_mu": b_mu, "b_rho": b_rho,
        "prior_mu": p_mu, "prior_logvar": p_lv,
        "in_sizes": jnp.asarray(in_sizes, jnp.int32),
        "out_sizes": jnp.asarray(out_sizes, jnp.int32),
    }
    meta = {"n_layers": n_layers, "d_pad": d_pad,
            "out_dim": layer_params[-1]["weight_mu"].shape[0]}
    return packed, meta


def make_eps(noise_key, n_layers, d_pad):
    """Fresh reparameterization noise for one forward pass (padded + stacked)."""
    kw, kb = jax.random.split(noise_key)
    eps_w = jax.random.normal(kw, (n_layers, d_pad, d_pad), jnp.float32)
    eps_b = jax.random.normal(kb, (n_layers, 1, d_pad), jnp.float32)
    return eps_w, eps_b


def deep_hbnn_forward(x, packed, meta, eps_w, eps_b, matmul_dtype=jnp.bfloat16):
    """Fused forward pass. Returns (output, kl_sum) with kl_sum shaped (1,)."""
    n_layers, d_pad = meta["n_layers"], meta["d_pad"]
    batch = x.shape[0]
    b_pad = _round_up(max(batch, _SUBLANE), _SUBLANE)
    x_p = jnp.zeros((b_pad, d_pad), jnp.float32).at[:batch, :x.shape[1]].set(x)

    kernel = functools.partial(fused_hbnn_kernel, matmul_dtype=matmul_dtype)

    smem = pl.BlockSpec(memory_space=pltpu.MemorySpace.SMEM)
    w_spec = pl.BlockSpec((1, d_pad, d_pad), lambda l: (l, 0, 0))
    b_spec = pl.BlockSpec((1, 1, d_pad), lambda l: (l, 0, 0))
    p_spec = pl.BlockSpec((1, 1, 1), lambda l: (l, 0, 0))
    x_spec = pl.BlockSpec((b_pad, d_pad), lambda l: (0, 0))

    y_pad, kl = pl.pallas_call(
        kernel,
        grid=(n_layers,),
        in_specs=[smem, smem, x_spec,
                  w_spec, w_spec, w_spec,
                  b_spec, b_spec, b_spec,
                  p_spec, p_spec],
        out_specs=(pl.BlockSpec((b_pad, d_pad), lambda l: (0, 0)),
                   pl.BlockSpec((1, 1), lambda l: (0, 0))),
        out_shape=(jax.ShapeDtypeStruct((b_pad, d_pad), jnp.float32),
                   jax.ShapeDtypeStruct((1, 1), jnp.float32)),
        scratch_shapes=[pltpu.VMEM((b_pad, d_pad), jnp.float32),   # activation
                        pltpu.VMEM((1, 1), jnp.float32)],          # KL accumulator
        compiler_params=pltpu.CompilerParams(
            dimension_semantics=("arbitrary",)),    # layer loop carries state
    )(packed["in_sizes"], packed["out_sizes"], x_p,
      packed["w_mu_t"], packed["w_rho_t"], eps_w,
      packed["b_mu"], packed["b_rho"], eps_b,
      packed["prior_mu"], packed["prior_logvar"])

    return y_pad[:batch, :meta["out_dim"]], kl.reshape((1,))


def reference_forward(x, layer_params, eps_w, eps_b):
    """Pure-JAX reference matching the PyTorch module (same eps as the kernel)."""
    h = x
    kl_sum = jnp.zeros((1,), jnp.float32)
    n_layers = len(layer_params)
    for i, p in enumerate(layer_params):
        out_f, in_f = p["weight_mu"].shape
        w_sigma = jax.nn.softplus(p["weight_rho"])
        b_sigma = jax.nn.softplus(p["bias_rho"])
        w = p["weight_mu"] + w_sigma * eps_w[i, :in_f, :out_f].T
        b = p["bias_mu"] + b_sigma * eps_b[i, 0, :out_f]
        h = h @ w.T + b
        if i < n_layers - 1:
            h = jnp.maximum(h, 0.0)
        prior_mu, prior_logvar = p["prior_mu"], p["prior_logvar"]
        prior_var = jnp.exp(prior_logvar)

        def kld(mu, sigma):
            return jnp.sum(jnp.log(jnp.sqrt(prior_var) / sigma)
                           + (sigma ** 2 + (mu - prior_mu) ** 2) / (2.0 * prior_var)
                           - 0.5)

        kl = (kld(p["weight_mu"], w_sigma) + kld(p["bias_mu"], b_sigma)
              + 0.5 * prior_mu ** 2 + 0.5 * prior_logvar ** 2)
        kl_sum = kl_sum + kl.reshape((1,))
    return h, kl_sum


if __name__ == "__main__":
    input_dim, hidden_dims, output_dim = 16, [32, 32], 8
    batch = 4

    root = jax.random.PRNGKey(0)
    k_x, k_params, k_noise = jax.random.split(root, 3)

    dims = [input_dim] + hidden_dims + [output_dim]
    layer_keys = jax.random.split(k_params, len(dims) - 1)
    layer_params = [init_layer_params(layer_keys[i], dims[i], dims[i + 1])
                    for i in range(len(dims) - 1)]

    packed, meta = pack_params(layer_params)
    x = jax.random.normal(k_x, (batch, input_dim), jnp.float32)
    eps_w, eps_b = make_eps(k_noise, meta["n_layers"], meta["d_pad"])

    y, kl_sum = deep_hbnn_forward(x, packed, meta, eps_w, eps_b)
    jax.block_until_ready((y, kl_sum))

    assert y.shape == (batch, output_dim)
    assert kl_sum.shape == (1,)
    assert bool(jnp.all(jnp.isfinite(y))) and bool(jnp.all(jnp.isfinite(kl_sum)))

    # Correctness vs. pure-JAX reference using the same noise.
    # Loose tolerance on y covers the bf16 MXU operands (f32 accumulation);
    # KL is all-f32 so it matches tightly relative to its magnitude (~1e4).
    y_ref, kl_ref = reference_forward(x, layer_params, eps_w, eps_b)
    assert bool(jnp.allclose(y, y_ref, atol=5e-2, rtol=5e-2))
    assert bool(jnp.allclose(kl_sum, kl_ref, rtol=1e-2, atol=1.0))

    print("KERNEL_OK")
</pallas_src>

<mosaic_0001>
module attributes {stable_mosaic.version = 11 : i64} {
  func.func @fused_hbnn_kernel(%arg0: i32, %arg1: memref<3xi32, #tpu.memory_space<smem>>, %arg2: memref<3xi32, #tpu.memory_space<smem>>, %arg3: memref<8x128xf32, #tpu.memory_space<vmem>>, %arg4: memref<1x128x128xf32, #tpu.memory_space<vmem>>, %arg5: memref<1x128x128xf32, #tpu.memory_space<vmem>>, %arg6: memref<1x128x128xf32, #tpu.memory_space<vmem>>, %arg7: memref<1x1x128xf32, #tpu.memory_space<vmem>>, %arg8: memref<1x1x128xf32, #tpu.memory_space<vmem>>, %arg9: memref<1x1x128xf32, #tpu.memory_space<vmem>>, %arg10: memref<1x1x1xf32, #tpu.memory_space<vmem>>, %arg11: memref<1x1x1xf32, #tpu.memory_space<vmem>>, %arg12: memref<8x128xf32, #tpu.memory_space<vmem>>, %arg13: memref<1x1xf32, #tpu.memory_space<vmem>>, %arg14: memref<8x128xf32, #tpu.memory_space<vmem>>, %arg15: memref<1x1xf32, #tpu.memory_space<vmem>>) attributes {dimension_semantics = [#tpu.dimension_semantics<arbitrary>], iteration_bounds = array<i64: 3>, scalar_prefetch = 0 : i64, scratch_operands = 2 : i64, tpu.core_type = #tpu.core_type<tc>, window_params = [{transform_indices = @transform_0, window_bounds = array<i64: 3>}, {transform_indices = @transform_1, window_bounds = array<i64: 3>}, {pipeline_mode = #tpu.pipeline_mode<synchronous>, transform_indices = @transform_2, window_bounds = array<i64: 8, 128>}, {transform_indices = @transform_3, window_bounds = array<i64: 1, 128, 128>}, {transform_indices = @transform_4, window_bounds = array<i64: 1, 128, 128>}, {transform_indices = @transform_5, window_bounds = array<i64: 1, 128, 128>}, {transform_indices = @transform_6, window_bounds = array<i64: 1, 1, 128>}, {transform_indices = @transform_7, window_bounds = array<i64: 1, 1, 128>}, {transform_indices = @transform_8, window_bounds = array<i64: 1, 1, 128>}, {transform_indices = @transform_9, window_bounds = array<i64: 1, 1, 1>}, {transform_indices = @transform_10, window_bounds = array<i64: 1, 1, 1>}, {pipeline_mode = #tpu.pipeline_mode<synchronous>, transform_indices = @transform_11, window_bounds = array<i64: 8, 128>}, {pipeline_mode = #tpu.pipeline_mode<synchronous>, transform_indices = @transform_12, window_bounds = array<i64: 1, 1>}]} {
    %c0_i32 = arith.constant 0 : i32
    %0 = arith.cmpi eq, %arg0, %c0_i32 : i32
    %1 = arith.extui %0 : i1 to i32
    %c0_i32_0 = arith.constant 0 : i32
    %2 = arith.cmpi ne, %1, %c0_i32_0 : i32
    scf.if %2 {
      %c0_51 = arith.constant 0 : index
      %c0_52 = arith.constant 0 : index
      %133 = vector.load %arg3[%c0_51, %c0_52] : memref<8x128xf32, #tpu.memory_space<vmem>>, vector<8x128xf32>
      %c0_53 = arith.constant 0 : index
      %c0_54 = arith.constant 0 : index
      %134 = vector.load %arg14[%c0_53, %c0_54] : memref<8x128xf32, #tpu.memory_space<vmem>>, vector<8x128xf32>
      tpu.vector_store %arg14[%c0_53, %c0_54], %133 {strides = array<i32>} : memref<8x128xf32, #tpu.memory_space<vmem>>, vector<8x128xf32>,
      %cst_55 = arith.constant 0.000000e+00 : f32
      %135 = vector.broadcast %cst_55 : f32 to vector<1x1xf32>
      %c0_56 = arith.constant 0 : index
      %c0_57 = arith.constant 0 : index
      %136 = vector.load %arg15[%c0_56, %c0_57] : memref<1x1xf32, #tpu.memory_space<vmem>>, vector<1x1xf32>
      tpu.vector_store %arg15[%c0_56, %c0_57], %135 {strides = array<i32>} : memref<1x1xf32, #tpu.memory_space<vmem>>, vector<1x1xf32>,
    } else {
    }
    %3 = arith.index_cast %arg0 : i32 to index
    %4 = memref.load %arg1[%3] : memref<3xi32, #tpu.memory_space<smem>>
    %5 = arith.index_cast %arg0 : i32 to index
    %6 = memref.load %arg2[%5] : memref<3xi32, #tpu.memory_space<smem>>
    %c0 = arith.constant 0 : index
    %c0_1 = arith.constant 0 : index
    %c0_2 = arith.constant 0 : index
    %7 = vector.load %arg4[%c0, %c0_1, %c0_2] : memref<1x128x128xf32, #tpu.memory_space<vmem>>, vector<1x128x128xf32>
    %8 = vector.shape_cast %7 : vector<1x128x128xf32> to vector<128x128xf32>
    %c0_3 = arith.constant 0 : index
    %c0_4 = arith.constant 0 : index
    %c0_5 = arith.constant 0 : index
    %9 = vector.load %arg5[%c0_3, %c0_4, %c0_5] : memref<1x128x128xf32, #tpu.memory_space<vmem>>, vector<1x128x128xf32>
    %10 = vector.shape_cast %9 : vector<1x128x128xf32> to vector<128x128xf32>
    %c0_6 = arith.constant 0 : index
    %c0_7 = arith.constant 0 : index
    %c0_8 = arith.constant 0 : index
    %11 = vector.load %arg7[%c0_6, %c0_7, %c0_8] : memref<1x1x128xf32, #tpu.memory_space<vmem>>, vector<1x1x128xf32>
    %12 = vector.shape_cast %11 : vector<1x1x128xf32> to vector<1x128xf32>
    %c0_9 = arith.constant 0 : index
    %c0_10 = arith.constant 0 : index
    %c0_11 = arith.constant 0 : index
    %13 = vector.load %arg8[%c0_9, %c0_10, %c0_11] : memref<1x1x128xf32, #tpu.memory_space<vmem>>, vector<1x1x128xf32>
    %14 = vector.shape_cast %13 : vector<1x1x128xf32> to vector<1x128xf32>
    %c0_12 = arith.constant 0 : index
    %c0_13 = arith.constant 0 : index
    %c0_14 = arith.constant 0 : index
    %15 = vector.load %arg10[%c0_12, %c0_13, %c0_14] : memref<1x1x1xf32, #tpu.memory_space<vmem>>, vector<1x1x1xf32>
    %16 = vector.shape_cast %15 : vector<1x1x1xf32> to vector<1x1xf32>
    %c0_15 = arith.constant 0 : index
    %c0_16 = arith.constant 0 : index
    %c0_17 = arith.constant 0 : index
    %17 = vector.load %arg11[%c0_15, %c0_16, %c0_17] : memref<1x1x1xf32, #tpu.memory_space<vmem>>, vector<1x1x1xf32>
    %18 = vector.shape_cast %17 : vector<1x1x1xf32> to vector<1x1xf32>
    %cst = arith.constant 0.000000e+00 : f32
    %19 = vector.broadcast %cst : f32 to vector<128x128xf32>
    %20 = arith.maximumf %10, %19 : vector<128x128xf32>
    %21 = math.absf %10 : vector<128x128xf32>
    %cst_18 = arith.constant 0.000000e+00 : f32
    %22 = vector.broadcast %cst_18 : f32 to vector<128x128xf32>
    %23 = arith.subf %22, %21 : vector<128x128xf32>
    %24 = math.exp %23 : vector<128x128xf32>
    %25 = math.log1p %24 : vector<128x128xf32>
    %26 = arith.addf %20, %25 : vector<128x128xf32>
    %cst_19 = arith.constant 0.000000e+00 : f32
    %27 = vector.broadcast %cst_19 : f32 to vector<1x128xf32>
    %28 = arith.maximumf %14, %27 : vector<1x128xf32>
    %29 = math.absf %14 : vector<1x128xf32>
    %cst_20 = arith.constant 0.000000e+00 : f32
    %30 = vector.broadcast %cst_20 : f32 to vector<1x128xf32>
    %31 = arith.subf %30, %29 : vector<1x128xf32>
    %32 = math.exp %31 : vector<1x128xf32>
    %33 = math.log1p %32 : vector<1x128xf32>
    %34 = arith.addf %28, %33 : vector<1x128xf32>
    %c0_21 = arith.constant 0 : index
    %c0_22 = arith.constant 0 : index
    %c0_23 = arith.constant 0 : index
    %35 = vector.load %arg6[%c0_21, %c0_22, %c0_23] : memref<1x128x128xf32, #tpu.memory_space<vmem>>, vector<1x128x128xf32>
    %36 = vector.shape_cast %35 : vector<1x128x128xf32> to vector<128x128xf32>
    %37 = arith.mulf %26, %36 : vector<128x128xf32>
    %38 = arith.addf %8, %37 : vector<128x128xf32>
    %c0_24 = arith.constant 0 : index
    %c0_25 = arith.constant 0 : index
    %c0_26 = arith.constant 0 : index
    %39 = vector.load %arg9[%c0_24, %c0_25, %c0_26] : memref<1x1x128xf32, #tpu.memory_space<vmem>>, vector<1x1x128xf32>
    %40 = vector.shape_cast %39 : vector<1x1x128xf32> to vector<1x128xf32>
    %41 = arith.mulf %34, %40 : vector<1x128xf32>
    %42 = arith.addf %12, %41 : vector<1x128xf32>
    %c0_27 = arith.constant 0 : index
    %c0_28 = arith.constant 0 : index
    %43 = vector.load %arg14[%c0_27, %c0_28] : memref<8x128xf32, #tpu.memory_space<vmem>>, vector<8x128xf32>
    %44 = arith.truncf %43 : vector<8x128xf32> to vector<8x128xbf16>
    %45 = arith.truncf %38 : vector<128x128xf32> to vector<128x128xbf16>
    %cst_29 = arith.constant dense<0.000000e+00> : vector<8x128xf32>
    %46 = tpu.matmul %44, %45, %cst_29 {dimension_numbers = #tpu.dot_dimension_numbers<[1], [0], [0], [1], [0, 0, 1, 1], [], []>} : vector<8x128xbf16>, vector<128x128xbf16>, vector<8x128xf32> -> vector<8x128xf32>
    %47 = vector.broadcast %42 : vector<1x128xf32> to vector<8x128xf32>
    %48 = arith.addf %46, %47 : vector<8x128xf32>
    %49 = tpu.iota {dimensions = array<i32: 1>} : vector<8x128xi32>
    %50 = vector.broadcast %6 : i32 to vector<8x128xi32>
    %51 = arith.cmpi slt, %49, %50 : vector<8x128xi32>
    %cst_30 = arith.constant 0.000000e+00 : f32
    %52 = vector.broadcast %cst_30 : f32 to vector<8x128xf32>
    %53 = arith.select %51, %48, %52 : vector<8x128xi1>, vector<8x128xf32>
    %c0_31 = arith.constant 0 : index
    %c0_32 = arith.constant 0 : index
    %54 = vector.load %arg14[%c0_31, %c0_32] : memref<8x128xf32, #tpu.memory_space<vmem>>, vector<8x128xf32>
    tpu.vector_store %arg14[%c0_31, %c0_32], %53 {strides = array<i32>} : memref<8x128xf32, #tpu.memory_space<vmem>>, vector<8x128xf32>,
    %c2_i32 = arith.constant 2 : i32
    %55 = arith.cmpi slt, %arg0, %c2_i32 : i32
    %56 = arith.extui %55 : i1 to i32
    %c0_i32_33 = arith.constant 0 : i32
    %57 = arith.cmpi ne, %56, %c0_i32_33 : i32
    scf.if %57 {
      %c0_51 = arith.constant 0 : index
      %c0_52 = arith.constant 0 : index
      %133 = vector.load %arg14[%c0_51, %c0_52] : memref<8x128xf32, #tpu.memory_space<vmem>>, vector<8x128xf32>
      %cst_53 = arith.constant 0.000000e+00 : f32
      %134 = vector.broadcast %cst_53 : f32 to vector<8x128xf32>
      %135 = arith.maximumf %133, %134 : vector<8x128xf32>
      %c0_54 = arith.constant 0 : index
      %c0_55 = arith.constant 0 : index
      %136 = vector.load %arg14[%c0_54, %c0_55] : memref<8x128xf32, #tpu.memory_space<vmem>>, vector<8x128xf32>
      tpu.vector_store %arg14[%c0_54, %c0_55], %135 {strides = array<i32>} : memref<8x128xf32, #tpu.memory_space<vmem>>, vector<8x128xf32>,
    } else {
    }
    %c2_i32_34 = arith.constant 2 : i32
    %58 = arith.cmpi eq, %arg0, %c2_i32_34 : i32
    %59 = arith.extui %58 : i1 to i32
    %c0_i32_35 = arith.constant 0 : i32
    %60 = arith.cmpi ne, %59, %c0_i32_35 : i32
    scf.if %60 {
      %c0_51 = arith.constant 0 : index
      %c0_52 = arith.constant 0 : index
      %133 = vector.load %arg14[%c0_51, %c0_52] : memref<8x128xf32, #tpu.memory_space<vmem>>, vector<8x128xf32>
      %c0_53 = arith.constant 0 : index
      %c0_54 = arith.constant 0 : index
      %134 = vector.load %arg12[%c0_53, %c0_54] : memref<8x128xf32, #tpu.memory_space<vmem>>, vector<8x128xf32>
      tpu.vector_store %arg12[%c0_53, %c0_54], %133 {strides = array<i32>} : memref<8x128xf32, #tpu.memory_space<vmem>>, vector<8x128xf32>,
    } else {
    }
    %61 = math.exp %18 : vector<1x1xf32>
    %62 = tpu.reciprocal %61 : vector<1x1xf32> -> vector<1x1xf32>
    %cst_36 = arith.constant 5.000000e-01 : f32
    %63 = vector.broadcast %cst_36 : f32 to vector<1x1xf32>
    %64 = arith.mulf %63, %62 : vector<1x1xf32>
    %cst_37 = arith.constant 5.000000e-01 : f32
    %65 = vector.broadcast %cst_37 : f32 to vector<1x1xf32>
    %66 = arith.mulf %65, %18 : vector<1x1xf32>
    %67 = tpu.iota {dimensions = array<i32: 0>} : vector<128x128xi32>
    %68 = tpu.iota {dimensions = array<i32: 1>} : vector<128x128xi32>
    %69 = vector.broadcast %4 : i32 to vector<128x128xi32>
    %70 = arith.cmpi slt, %67, %69 : vector<128x128xi32>
    %71 = vector.broadcast %6 : i32 to vector<128x128xi32>
    %72 = arith.cmpi slt, %68, %71 : vector<128x128xi32>
    %73 = arith.andi %70, %72 : vector<128x128xi1>
    %74 = tpu.iota {dimensions = array<i32: 1>} : vector<1x128xi32>
    %75 = vector.broadcast %6 : i32 to vector<1x128xi32>
    %76 = arith.cmpi slt, %74, %75 : vector<1x128xi32>
    %77 = arith.muli %4, %6 : i32
    %78 = arith.sitofp %77 : i32 to f32
    %79 = arith.sitofp %6 : i32 to f32
    %80 = arith.mulf %26, %26 : vector<128x128xf32>
    %81 = vector.broadcast %16 : vector<1x1xf32> to vector<128x128xf32>
    %82 = arith.subf %8, %81 : vector<128x128xf32>
    %83 = arith.mulf %82, %82 : vector<128x128xf32>
    %84 = arith.addf %80, %83 : vector<128x128xf32>
    %85 = vector.broadcast %64 : vector<1x1xf32> to vector<128x128xf32>
    %86 = arith.mulf %84, %85 : vector<128x128xf32>
    %87 = math.log %26 : vector<128x128xf32>
    %88 = arith.subf %86, %87 : vector<128x128xf32>
    %cst_38 = arith.constant 0.000000e+00 : f32
    %89 = vector.broadcast %cst_38 : f32 to vector<128x128xf32>
    %90 = arith.select %73, %88, %89 : vector<128x128xi1>, vector<128x128xf32>
    %91 = vector.shape_cast %90 : vector<128x128xf32> to vector<1x128x128xf32>
    %cst_39 = arith.constant dense<0.000000e+00> : vector<1xf32>
    %92 = vector.multi_reduction <add>, %91, %cst_39 [1, 2] : vector<1x128x128xf32> to vector<1xf32>
    %93 = vector.shape_cast %92 : vector<1xf32> to vector<1x1x1xf32>
    %94 = vector.extract %93[0, 0, 0] : f32 from vector<1x1x1xf32>
    %95 = vector.broadcast %94 : f32 to vector<1x1xf32>
    %96 = arith.mulf %34, %34 : vector<1x128xf32>
    %97 = vector.broadcast %16 : vector<1x1xf32> to vector<1x128xf32>
    %98 = arith.subf %12, %97 : vector<1x128xf32>
    %99 = arith.mulf %98, %98 : vector<1x128xf32>
    %100 = arith.addf %96, %99 : vector<1x128xf32>
    %101 = vector.broadcast %64 : vector<1x1xf32> to vector<1x128xf32>
    %102 = arith.mulf %100, %101 : vector<1x128xf32>
    %103 = math.log %34 : vector<1x128xf32>
    %104 = arith.subf %102, %103 : vector<1x128xf32>
    %cst_40 = arith.constant 0.000000e+00 : f32
    %105 = vector.broadcast %cst_40 : f32 to vector<1x128xf32>
    %106 = arith.select %76, %104, %105 : vector<1x128xi1>, vector<1x128xf32>
    %107 = vector.shape_cast %106 : vector<1x128xf32> to vector<1x1x128xf32>
    %cst_41 = arith.constant dense<0.000000e+00> : vector<1xf32>
    %108 = vector.multi_reduction <add>, %107, %cst_41 [1, 2] : vector<1x1x128xf32> to vector<1xf32>
    %109 = vector.shape_cast %108 : vector<1xf32> to vector<1x1x1xf32>
    %110 = vector.extract %109[0, 0, 0] : f32 from vector<1x1x1xf32>
    %111 = vector.broadcast %110 : f32 to vector<1x1xf32>
    %112 = arith.addf %95, %111 : vector<1x1xf32>
    %113 = arith.addf %78, %79 : f32
    %cst_42 = arith.constant 5.000000e-01 : f32
    %114 = vector.broadcast %cst_42 : f32 to vector<1x1xf32>
    %115 = arith.subf %66, %114 : vector<1x1xf32>
    %116 = vector.broadcast %113 : f32 to vector<1x1xf32>
    %117 = arith.mulf %116, %115 : vector<1x1xf32>
    %118 = arith.addf %112, %117 : vector<1x1xf32>
    %cst_43 = arith.constant 5.000000e-01 : f32
    %119 = vector.broadcast %cst_43 : f32 to vector<1x1xf32>
    %120 = arith.mulf %119, %16 : vector<1x1xf32>
    %121 = arith.mulf %120, %16 : vector<1x1xf32>
    %122 = arith.addf %118, %121 : vector<1x1xf32>
    %cst_44 = arith.constant 5.000000e-01 : f32
    %123 = vector.broadcast %cst_44 : f32 to vector<1x1xf32>
    %124 = arith.mulf %123, %18 : vector<1x1xf32>
    %125 = arith.mulf %124, %18 : vector<1x1xf32>
    %126 = arith.addf %122, %125 : vector<1x1xf32>
    %c0_45 = arith.constant 0 : index
    %c0_46 = arith.constant 0 : index
    %127 = vector.load %arg15[%c0_45, %c0_46] : memref<1x1xf32, #tpu.memory_space<vmem>>, vector<1x1xf32>
    %128 = arith.addf %127, %126 : vector<1x1xf32>
    %c0_47 = arith.constant 0 : index
    %c0_48 = arith.constant 0 : index
    %129 = vector.load %arg15[%c0_47, %c0_48] : memref<1x1xf32, #tpu.memory_space<vmem>>, vector<1x1xf32>
    tpu.vector_store %arg15[%c0_47, %c0_48], %128 {strides = array<i32>} : memref<1x1xf32, #tpu.memory_space<vmem>>, vector<1x1xf32>,
    %c2_i32_49 = arith.constant 2 : i32
    %130 = arith.cmpi eq, %arg0, %c2_i32_49 : i32
    %131 = arith.extui %130 : i1 to i32
    %c0_i32_50 = arith.constant 0 : i32
    %132 = arith.cmpi ne, %131, %c0_i32_50 : i32
    scf.if %132 {
      %c0_51 = arith.constant 0 : index
      %c0_52 = arith.constant 0 : index
      %133 = vector.load %arg15[%c0_51, %c0_52] : memref<1x1xf32, #tpu.memory_space<vmem>>, vector<1x1xf32>
      %c0_53 = arith.constant 0 : index
      %c0_54 = arith.constant 0 : index
      %134 = vector.load %arg13[%c0_53, %c0_54] : memref<1x1xf32, #tpu.memory_space<vmem>>, vector<1x1xf32>
      tpu.vector_store %arg13[%c0_53, %c0_54], %133 {strides = array<i32>} : memref<1x1xf32, #tpu.memory_space<vmem>>, vector<1x1xf32>,
    } else {
    }
    return
  }
  func.func @transform_0(%arg0: i32) -> i32 {
    %c0_i32 = arith.constant 0 : i32
    %c0_i32_0 = arith.constant 0 : i32
    return %c0_i32 : i32
  }
  func.func @transform_1(%arg0: i32) -> i32 {
    %c0_i32 = arith.constant 0 : i32
    %c0_i32_0 = arith.constant 0 : i32
    return %c0_i32 : i32
  }
  func.func @transform_2(%arg0: i32) -> (i32, i32) {
    %c0_i32 = arith.constant 0 : i32
    %c0_i32_0 = arith.constant 0 : i32
    %c0_i32_1 = arith.constant 0 : i32
    return %c0_i32, %c0_i32_0 : i32, i32
  }
  func.func @transform_3(%arg0: i32) -> (i32, i32, i32) {
    %c0_i32 = arith.constant 0 : i32
    %c0_i32_0 = arith.constant 0 : i32
    %c0_i32_1 = arith.constant 0 : i32
    return %arg0, %c0_i32, %c0_i32_0 : i32, i32, i32
  }
  func.func @transform_4(%arg0: i32) -> (i32, i32, i32) {
    %c0_i32 = arith.constant 0 : i32
    %c0_i32_0 = arith.constant 0 : i32
    %c0_i32_1 = arith.constant 0 : i32
    return %arg0, %c0_i32, %c0_i32_0 : i32, i32, i32
  }
  func.func @transform_5(%arg0: i32) -> (i32, i32, i32) {
    %c0_i32 = arith.constant 0 : i32
    %c0_i32_0 = arith.constant 0 : i32
    %c0_i32_1 = arith.constant 0 : i32
    return %arg0, %c0_i32, %c0_i32_0 : i32, i32, i32
  }
  func.func @transform_6(%arg0: i32) -> (i32, i32, i32) {
    %c0_i32 = arith.constant 0 : i32
    %c0_i32_0 = arith.constant 0 : i32
    %c0_i32_1 = arith.constant 0 : i32
    return %arg0, %c0_i32, %c0_i32_0 : i32, i32, i32
  }
  func.func @transform_7(%arg0: i32) -> (i32, i32, i32) {
    %c0_i32 = arith.constant 0 : i32
    %c0_i32_0 = arith.constant 0 : i32
    %c0_i32_1 = arith.constant 0 : i32
    return %arg0, %c0_i32, %c0_i32_0 : i32, i32, i32
  }
  func.func @transform_8(%arg0: i32) -> (i32, i32, i32) {
    %c0_i32 = arith.constant 0 : i32
    %c0_i32_0 = arith.constant 0 : i32
    %c0_i32_1 = arith.constant 0 : i32
    return %arg0, %c0_i32, %c0_i32_0 : i32, i32, i32
  }
  func.func @transform_9(%arg0: i32) -> (i32, i32, i32) {
    %c0_i32 = arith.constant 0 : i32
    %c0_i32_0 = arith.constant 0 : i32
    %c0_i32_1 = arith.constant 0 : i32
    return %arg0, %c0_i32, %c0_i32_0 : i32, i32, i32
  }
  func.func @transform_10(%arg0: i32) -> (i32, i32, i32) {
    %c0_i32 = arith.constant 0 : i32
    %c0_i32_0 = arith.constant 0 : i32
    %c0_i32_1 = arith.constant 0 : i32
    return %arg0, %c0_i32, %c0_i32_0 : i32, i32, i32
  }
  func.func @transform_11(%arg0: i32) -> (i32, i32) {
    %c0_i32 = arith.constant 0 : i32
    %c0_i32_0 = arith.constant 0 : i32
    %c0_i32_1 = arith.constant 0 : i32
    return %c0_i32, %c0_i32_0 : i32, i32
  }
  func.func @transform_12(%arg0: i32) -> (i32, i32) {
    %c0_i32 = arith.constant 0 : i32
    %c0_i32_0 = arith.constant 0 : i32
    %c0_i32_1 = arith.constant 0 : i32
    return %c0_i32, %c0_i32_0 : i32, i32
  }
}

</mosaic_0001>

<bundles_post_ra>
// kernel: tpu_custom_call.1
= control target key start
LH: loop header
LB: loop body
LE: loop exit
PB: predicated region body
PF: predicated region fallthrough
CT: control target
= control target key end

     0   :  { %s3139_s0 = inlined_call_operand.hbm [shape: s32[3], index: 0, kind: input, shape index: {}]   ;;  %s3140_s1 = inlined_call_operand.hbm [shape: s32[3], index: 1, kind: input, shape index: {}]   ;;  %s3141_s2 = inlined_call_operand.vmem [shape: f32[8,128], index: 2, kind: input, shape index: {}]   ;;  %s3142_s3 = inlined_call_operand.hbm [shape: f32[3,128,128], index: 3, kind: input, shape index: {}]   ;;  %s3143_s4 = inlined_call_operand.hbm [shape: f32[3,128,128], index: 4, kind: input, shape index: {}]   ;;  %s3144_s5 = inlined_call_operand.hbm [shape: f32[3,128,128], index: 5, kind: input, shape index: {}]   ;;  %s3145_s6 = inlined_call_operand.vmem [shape: f32[3,1,128], index: 6, kind: input, shape index: {}]   ;;  %s3146_s7 = inlined_call_operand.vmem [shape: f32[3,1,128], index: 7, kind: input, shape index: {}]   ;;  %s3147_s8 = inlined_call_operand.vmem [shape: f32[3,1,128], index: 8, kind: input, shape index: {}]   ;;  %s3148_s9 = inlined_call_operand.vmem [shape: f32[3,1,1], index: 9, kind: input, shape index: {}]   ;;  %s3149_s10 = inlined_call_operand.vmem [shape: f32[3,1,1], index: 10, kind: input, shape index: {}]   ;;  %s3150_s11 = inlined_call_operand.hbm [shape: f32[8,128], index: 11, kind: output, shape index: {0}]   ;;  %s3151_s12 = inlined_call_operand.hbm [shape: f32[1,1], index: 12, kind: output, shape index: {1}]  }
   0x1   :  { %3174 = sst [smem:[#allocation35_spill]] %s3141_s2 }
   0x2   :  { %3175 = sst [smem:[#allocation36_spill]] %s3142_s3 }
   0x3   :  { %3176 = sst [smem:[#allocation37_spill]] %s3143_s4 }
   0x4   :  { %3177 = sst [smem:[#allocation38_spill]] %s3148_s9 }
   0x5   :  { %3178 = sst [smem:[#allocation39_spill]] %s3149_s10 }
   0x6   :  { %3179 = sst [smem:[#allocation40_spill]] %s3150_s11 }
   0x7   :  { %3180 = sst [smem:[#allocation41_spill]] %s3151_s12 }
   0x8   :  { %18 = vsyncpa [#allocation7], 0 }
   0x9   :  { %19 = vsyncpa [#allocation9], 0 }
   0xa   :  { %20 = vsyncpa [#allocation5], 0 }
   0xb   :  { %22 = vsyncpa [#allocation5 + $0x1], 0 }
   0xc   :  { %23 = vsyncpa [#allocation12], 0 }
   0xd   :  { %25 = vsyncpa [#allocation12 + $0x1], 0 }
   0xe   :  { %26 = vsyncpa [#allocation6], 0 }
   0xf   :  { %27 = vsyncpa [#allocation16], 0  ;;  %s2075_s21 = smov 0   ;;  %s2077_s22 = smov 0  }
  0x10   :  { %s2079_s23 = smov 0   ;;  %s2081_s24 = smov 0  }
  0x11 LB: > { %3181 = sst [smem:[#allocation23_spill]] %s1991_s23  ;;  %s2096_s25 = sadd.s32 1, %s1995_s24   ;;  %s1995_s24 = sphi %s2081_s24, %s3267_s24   ;;  %s1991_s23 = sphi %s2079_s23, %s3269_s23   ;;  %s1987_s22 = sphi %s2077_s22, %s3271_s22   ;;  %s1983_s21 = sphi %s2075_s21, %s3270_s21  }
  0x12   : > { %3182 = sst [smem:[#allocation24_spill]] %s2096_s25  ;;  %s103_s26 = sadd.s32 1, %s1991_s23 }
  0x13   : > { %s100_s27 = ssub.s32 %s1995_s24, %s2096_s25  ;;  %p110_p0 = scmp.ne.s32.totalorder %s1991_s23, %s1987_s22 }
  0x14   : > { %p101_p1 = scmp.eq.s32.totalorder %s100_s27, 0  ;;  %p111_p2 = scmp.eq.s32.totalorder %s1995_s24, 0 }
  0x15   : > { %p1616_p3 = scmp.lt.s32.totalorder %s1995_s24, 3  ;;  %s3152_s29 = sand.u32 1, %s1991_s23  }
  0x16   : > { %s2106_s28 = scalar_select %p101_p1, %s1991_s23, %s103_s26  }
  0x17   : > { %p112_p4 = por %p111_p2, %p110_p0  ;;  %s2111_s30 = sshll.u32 %s3152_s29, 7 }
  0x18   : > { %3183 = sst [smem:[#allocation25_spill]] %s2106_s28  ;;  %s2114_s13 = sshll.u32 %s1995_s24, 11 }
  0x19   : > { %p2116_p5 = pnand %p1616_p3, %p112_p4  ;;  %s406_s15 = sand.u32 1, %s1995_s24  }
  0x1a   : > { %s3185_s4 = sld [smem:[#allocation37_spill]]  ;;  %s410_s19 = scalar_lea.vmem [#allocation11], %s2111_s30 }
  0x1b   : > { %s417_s20 = sshll.u32 %s410_s19, 4  ;;  %s2130_s26 = scalar_lea.sflag [#allocation12], %s406_s15  ;;  %s2128_s20 = int_to_ptr.vmem [resolvable:$true] %s417_s20 }
  0x1c   : > { %p2136_p7 = pneg %p2116_p5 }
  0x20   : > { %s2125_s18 = scalar_lea.hbm %s3185_s4, %s2114_s13  ;;  %s1778_s28 = scalar_lea.hbm %s3185_s4, 6144 }
  0x21   : > { %s1773_s27 = scalar_lea.hbm %s2125_s18, 2048  ;;  %p1779_p10 = scmp.lt.u32.totalorder %s2125_s18, %s3185_s4 }
  0x22   : > { %p1774_p6 = scmp.ne.s32.totalorder %s2125_s18, %s1773_s27  ;;  %p1780_p11 = scmp.lt.u32.totalorder %s1778_s28, %s1773_s27 }
  0x23   : > { %p1782_p13 = scmp.lt.u32.totalorder %s1773_s27, %s2125_s18 }
  0x24   : > { %p1776_p8 = pnand %p2136_p7, %p1774_p6  ;;  %p1781_p12 = por %p1780_p11, %p1779_p10 }
  0x26   : > { %p1777_p9 = pneg %p1776_p8  ;;  %p1783_p0 = por %p1782_p13, %p1781_p12 }
  0x28   : > { %p1784_p1 = pnand %p1783_p0, %p1777_p9 }
  0x2a   : > { %1787 = shalt.err (!%p1784_p1)
}
  0x2b   : > { %s1788_s15 = scalar_lea.vmem %s2128_s20, 2048  ;;  %s1997_s16 = smov [#allocation11]  }
  0x2c   : > { %p1789_p2 = scmp.ne.s32.totalorder %s2128_s20, %s1788_s15  ;;  %s1793_s17 = sshll.u32 %s1997_s16, 4  ;;  %s1794_s17 = int_to_ptr.vmem [resolvable:$false] %s1793_s17 }
  0x2d   : > { %s1795_s25 = scalar_lea.vmem %s1794_s17, 4096  ;;  %p1796_p6 = scmp.lt.s32.totalorder %s2128_s20, %s1794_s17 }
  0x2e   : > { %p1791_p3 = pnand %p1789_p2, %p2136_p7  ;;  %p1797_p8 = scmp.lt.s32.totalorder %s1795_s25, %s1788_s15 }
  0x30   : > { %p1792_p4 = pneg %p1791_p3  ;;  %p1798_p10 = por %p1797_p8, %p1796_p6 }
  0x32   : > { %p1799_p11 = pnand %p1798_p10, %p1792_p4 }
  0x34   : > { %1802 = shalt.err (!%p1799_p11)
}
  0x35   : > { %s3155_s28 = smov 128   ;;  %s3157_s27 = smov 8  }
  0x36   : > { %1610 = dma.hbm_to_vmem [thread:$0]  (!%p2116_p5), %s2125_s18, 2048, %s2128_s20, %s2130_s26, %s3155_s28, %s3155_s28, %s3157_s27  }
  0x37   : > { %s2164_s19 = sadd.s32 4294967295, %s1995_s24   ;;  %p116_p9 = scmp.ne.s32.totalorder %s1987_s22, %s1983_s21 }
  0x38   : > { %p3161_p12 = scmp.eq.s32.totalorder %s2164_s19, 0  ;;  %p1509_p13 = scmp.ge.s32.totalorder %s1995_s24, 1 }
  0x39   : > { %p351_p0 = scmp.lt.s32.totalorder %s1995_s24, 4  ;;  %s3189_s3 = sld [smem:[#allocation36_spill]] }
  0x3a   : > { %p2174_p2 = por %p3161_p12, %p116_p9  ;;  %s389_s24 = scalar_lea.vmem [#allocation10], %s2111_s30 }
  0x3b   : > { %p2178_p3 = pnand %p1509_p13, %p351_p0  ;;  %s396_s17 = sshll.u32 %s389_s24, 4  ;;  %s2197_s17 = int_to_ptr.vmem [resolvable:$true] %s396_s17 }
  0x3c   : > { %s3187_s15 = scalar_select %p2174_p2, 1, 0 }
  0x3d   : > { %s3188_s16 = scalar_select %p2178_p3, 1, 0 }
  0x3e   : > { %p1597_p4 = pneg %p2178_p3  ;;  %s3191_s28 = sand.u32 1, %s1991_s23  }
  0x3f   : > { %s2188_s21 = scalar_lea.hbm %s3189_s3, %s2114_s13  ;;  %s2201_s27 = scalar_lea.sflag [#allocation5], %s3191_s28 }
  0x40   : > { %p2193_p6 = pnand %p1597_p4, %p3161_p12  ;;  %s1803_s4 = scalar_lea.hbm %s2188_s21, 2048 }
  0x41   : > { %p1804_p8 = scmp.ne.s32.totalorder %s2188_s21, %s1803_s4  ;;  %s1808_s12 = scalar_lea.hbm %s3189_s3, 6144 }
  0x42   : > { %s3190_s25 = scalar_select %p2193_p6, 1, 0 }
  0x43   : > { %p1806_p10 = pnand %p1804_p8, %p2136_p7  ;;  %p1809_p9 = scmp.lt.u32.totalorder %s2188_s21, %s3189_s3 }
  0x44   : > { %p1810_p13 = scmp.lt.u32.totalorder %s1808_s12, %s1803_s4  ;;  %p1812_p4 = scmp.lt.u32.totalorder %s1803_s4, %s2188_s21 }
  0x45   : > { %p1807_p11 = pneg %p1806_p10 }
  0x46   : > { %p1811_p0 = por %p1810_p13, %p1809_p9 }
  0x48   : > { %p1813_p1 = por %p1812_p4, %p1811_p0 }
  0x4a   : > { %p1814_p12 = pnand %p1813_p1, %p1807_p11 }
  0x4c   : > { %1817 = shalt.err (!%p1814_p12)
}
  0x4d   : > { %s1818_s28 = scalar_lea.vmem %s2197_s17, 2048  ;;  %s2000_s18 = smov [#allocation10]  }
  0x4e   : > { %p1819_p8 = scmp.ne.s32.totalorder %s2197_s17, %s1818_s28  ;;  %s1823_s20 = sshll.u32 %s2000_s18, 4  ;;  %s1824_s20 = int_to_ptr.vmem [resolvable:$false] %s1823_s20 }
  0x4f   : > { %s1825_s11 = scalar_lea.vmem %s1824_s20, 4096  ;;  %p1826_p3 = scmp.lt.s32.totalorder %s2197_s17, %s1824_s20 }
  0x50   : > { %p1821_p10 = pnand %p1819_p8, %p2136_p7  ;;  %p1827_p6 = scmp.lt.s32.totalorder %s1825_s11, %s1818_s28 }
  0x52   : > { %p1822_p2 = pneg %p1821_p10  ;;  %p1828_p9 = por %p1827_p6, %p1826_p3 }
  0x54   : > { %p1829_p13 = pnand %p1828_p9, %p1822_p2 }
  0x56   : > { %1832 = shalt.err (!%p1829_p13)
}
  0x57   : > { %s3192_s4 = smov 8   ;;  %s3193_s12 = smov 128  }
  0x58   : > { %1607 = dma.hbm_to_vmem [thread:$0]  (!%p2116_p5), %s2188_s21, 2048, %s2197_s17, %s2201_s27, %s3193_s12, %s3193_s12, %s3192_s4  }
  0x59   : > { %s2232_s3 = scalar_lea.hbm %s3144_s5, %s2114_s13  ;;  %s1833_s11 = scalar_lea.hbm %s3139_s0, 16 }
  0x5a   : > { %p1834_p12 = scmp.ne.s32.totalorder %s3139_s0, %s1833_s11  ;;  %p3194_p1 = scmp.ne.s32.totalorder %s3190_s25, 0 }
  0x5b   : > { %p1840_p11 = scmp.lt.u32.totalorder %s1833_s11, %s3139_s0 }
  0x5c   : > { %p1835_p2 = pneg %p3194_p1 }
  0x5e   : > { %p1836_p3 = pnand %p1835_p2, %p1834_p12 }
  0x60   : > { %p1837_p6 = pneg %p1836_p3 }
  0x62   : > { %p1842_p0 = pnand %p1840_p11, %p1837_p6 }
  0x64   : > { %1845 = shalt.err (!%p1842_p0)
}
  0x65   : > { %s2001_s13 = smov [#allocation4]   ;;  %s1846_s23 = scalar_lea.hbm %s3140_s1, 16 }
  0x66   : > { %1600 = dma.hbm_to_smem (!%p3194_p1), %s3139_s0, 16, %s2001_s13, [#allocation7]  }
  0x67   : > { %p1847_p4 = scmp.ne.s32.totalorder %s3140_s1, %s1846_s23  ;;  %p1853_p9 = scmp.lt.u32.totalorder %s1846_s23, %s3140_s1 }
  0x69   : > { %p1849_p8 = pnand %p1847_p4, %p1835_p2 }
  0x6b   : > { %p1850_p10 = pneg %p1849_p8 }
  0x6d   : > { %p1855_p13 = pnand %p1853_p9, %p1850_p10 }
  0x6f   : > { %1858 = shalt.err (!%p1855_p13)
}
  0x70   : > { %s2002_s28 = smov [#allocation8]   ;;  %s431_s13 = scalar_lea.vmem [#allocation13], %s2111_s30 }
  0x71   : > { %1603 = dma.hbm_to_smem (!%p3194_p1), %s3140_s1, 16, %s2002_s28, [#allocation9]  }
  0x72   : > { %s438_s27 = sshll.u32 %s431_s13, 4  ;;  %s1859_s21 = scalar_lea.hbm %s2232_s3, 2048  ;;  %s2265_s27 = int_to_ptr.vmem [resolvable:$true] %s438_s27 }
  0x73   : > { %p1860_p12 = scmp.ne.s32.totalorder %s2232_s3, %s1859_s21  ;;  %s1864_s2 = scalar_lea.hbm %s3144_s5, 6144 }
  0x74   : > { %p1865_p6 = scmp.lt.u32.totalorder %s2232_s3, %s3144_s5  ;;  %p1866_p11 = scmp.lt.u32.totalorder %s1864_s2, %s1859_s21 }
  0x75   : > { %p1862_p2 = pnand %p1860_p12, %p2136_p7  ;;  %p1868_p1 = scmp.lt.u32.totalorder %s1859_s21, %s2232_s3 }
  0x76   : > { %p1867_p0 = por %p1866_p11, %p1865_p6 }
  0x77   : > { %p1863_p3 = pneg %p1862_p2 }
  0x78   : > { %p1869_p4 = por %p1868_p1, %p1867_p0 }
  0x7a   : > { %p1870_p8 = pnand %p1869_p4, %p1863_p3 }
  0x7c   : > { %1873 = shalt.err (!%p1870_p8)
}
  0x7d   : > { %s1874_s30 = scalar_lea.vmem %s2265_s27, 2048  ;;  %s2003_s18 = smov [#allocation13]  }
  0x7e   : > { %p1875_p10 = scmp.ne.s32.totalorder %s2265_s27, %s1874_s30  ;;  %s1879_s9 = sshll.u32 %s2003_s18, 4  ;;  %s1880_s9 = int_to_ptr.vmem [resolvable:$false] %s1879_s9 }
  0x7f   : > { %s1881_s10 = scalar_lea.vmem %s1880_s9, 4096  ;;  %p1882_p12 = scmp.lt.s32.totalorder %s2265_s27, %s1880_s9 }
  0x80   : > { %p1877_p9 = pnand %p1875_p10, %p2136_p7  ;;  %p1883_p2 = scmp.lt.s32.totalorder %s1881_s10, %s1874_s30 }
  0x82   : > { %p1878_p13 = pneg %p1877_p9  ;;  %p1884_p6 = por %p1883_p2, %p1882_p12 }
  0x84   : > { %p1885_p11 = pnand %p1884_p6, %p1878_p13 }
  0x86   : > { %1888 = shalt.err (!%p1885_p11)
}
  0x87   : > { %1613 = dma.hbm_to_vmem [thread:$0]  (!%p2116_p5), %s2232_s3, 2048, %s2265_s27, %s2130_s26, %s3193_s12, %s3193_s12, %s3192_s4  }
  0x88   : > { %p3195_p7 = scmp.ne.s32.totalorder %s3188_s16, 0 }
  0x8a   : > { %480 = sbr.rel (%p3195_p7) target bundleno = 981 (0x3d5), region = 64 }
  0x91   : > { %p3196_p3 = scmp.eq.s32.totalorder %s2164_s19, 0 }
  0x93   : > { %1958 = dma.done.wait (%p3196_p3), [#allocation7], 16   ;;  %p3197_p0 = pmov %p3196_p3 }
  0x95   : > { %1960 = vsyncadd (%p3197_p0), [#allocation7], 4294967280  ;;  %p3198_p1 = pmov %p3197_p0 }
  0x96   : > { %p3199_p4 = pmov %p3197_p0 }
  0x97   : > { %1962 = dma.done.wait (%p3198_p1), [#allocation9], 16  }
  0x98   : > { %1964 = vsyncadd (%p3199_p4), [#allocation9], 4294967280  ;;  %s490_s29 = sand.u32 1, %s1987_s22   ;;  %p3200_p5 = scmp.ne.s32.totalorder %s3187_s15, 0 }
  0x99   : > { %s1525_s14 = sshll.u32 %s490_s29, 7  ;;  %s491_s3 = scalar_lea.sflag [#allocation5], %s490_s29 }
  0x9a   : > { %s2303_s26 = scalar_lea.vmem [#allocation10], %s1525_s14 }
  0x9b   : > { %1966 = dma.done.wait (%p3200_p5), %s491_s3, 2048  }
  0x9c   : > { %1968 = vsyncadd (%p3200_p5), %s491_s3, 4294965248  ;;  %s499_s16 = sand.u32 1, %s2164_s19   ;;  %s2310_s12 = scalar_lea.vmem [#allocation11], %s1525_s14 }
  0x9d   : > { %s500_s4 = scalar_lea.sflag [#allocation12], %s499_s16 }
  0x9e   : > { %1970 = dma.done.wait (%p3200_p5), %s500_s4, 4096  }
  0x9f   : > { %1972 = vsyncadd (%p3200_p5), %s500_s4, 4294963200  ;;  %s2316_s28 = scalar_lea.vmem [#allocation13], %s1525_s14 }
  0xa0   : > { %517 = sfence }
  0xa1   : > { %p574_p8 = scmp.lt.s32.totalorder %s2164_s19, 2  ;;  %s3201_s18 = sld [smem:[#allocation38_spill]] }
  0xa2   : > { %s3202_s14 = sld [smem:[#allocation39_spill]]  ;;  %p3203_p10 = scmp.ne.s32.totalorder %s2164_s19, 0 }
  0xa3   : > { %s2320_s20 = scalar_select %p574_p8, %s2164_s19, 2 }
  0xa4   : > { %593 = sbr.rel (%p3203_p10) target bundleno = 172 (0xac), region = 88  ;;  %s3204_s11 = sld [smem:[#allocation35_spill]] (!%p3203_p10)  ;;  %vm596_vm0 = vcmask (!%p3203_p10), 0   ;;  %v2004_v1 = vmov (!%p3203_p10), 0.0  }
  0xa5   : > { %s576_s27 = scalar_lea.vmem %s3145_s6, %s2320_s20  ;;  %s579_s25 = scalar_lea.vmem %s3146_s7, %s2320_s20  ;;  %597 = vst.msk [vmem:[#allocation3] sm:$0x1] (!%p3203_p10), %vm596_vm0, %v2004_v1 }
  0xa6   : > { %s582_s23 = scalar_lea.vmem %s3147_s8, %s2320_s20 }
  0xa7   : > { %s585_s9 = scalar_lea.vmem %s3201_s18, %s2320_s20 }
  0xa8   : > { %s588_s3 = scalar_lea.vmem %s3202_s14, %s2320_s20 }
  0xaa   : > { %v594_v0 = vld [vmem:[%s3204_s11] sm:$0xff] (!%p3203_p10) }
  0xab   : > { %595 = vst [vmem:[#allocation2] sm:$0xff] %v594_v0 }
  0xac PF: > { %s2348_s13 = sld [smem:[#allocation4 + %s2164_s19]]  ;;  %v2350_v2 = vld [vmem:[%s585_s9] sm:$0x1]  ;;  %v2005_v4 = vmov 0.0   ;;  %v2356_v5 = vld [vmem:[%s2310_s12] sm:$0xff]  ;;  %v2359_v6 = vld [vmem:[%s2310_s12 + $0x8] sm:$0xff] }
  0xad   : > { %3205 = vst [vmem:[#allocation26_spill] sm:$0xff] %v2350_v2  ;;  %v2352_v3 = vld [vmem:[%s588_s3] sm:$0x1]  ;;  %1551 = vmatprep.subr.bf16.mxu0 %v2005_v4  ;;  %v652_v7 = vand.u32 2147483647, %v2356_v5  ;;  %vm2006_vm1 = vmmov 0  }
  0xae   : > { %3206 = vst [vmem:[#allocation27_spill] sm:$0xff] %v2352_v3  ;;  %1567 = vmatprep.mubr.msk.bf16.mxu0 %vm2006_vm1, %v2005_v4  ;;  %v653_v8 = vand.u32 2147483647, %v2359_v6  ;;  %v2365_v9 = vld [vmem:[%s2310_s12 + $0x10] sm:$0xff]  ;;  %v2368_v11 = vld [vmem:[%s2310_s12 + $0x18] sm:$0xff]  ;;  %v2373_v17 = vld [vmem:[%s2310_s12 + $0x20] sm:$0xff] }
  0xaf   : > { %v668_v10 = vsub.f32 0.0, %v652_v7  ;;  %v654_v12 = vand.u32 2147483647, %v2365_v9  ;;  %v655_v14 = vand.u32 2147483647, %v2368_v11  ;;  %v2376_v18 = vld [vmem:[%s2310_s12 + $0x28] sm:$0xff] }
  0xb0   : > { %v669_v13 = vsub.f32 0.0, %v653_v8  ;;  %v656_v22 = vand.u32 2147483647, %v2373_v17  ;;  %v657_v23 = vand.u32 2147483647, %v2376_v18  ;;  %v2381_v27 = vld [vmem:[%s2310_s12 + $0x30] sm:$0xff] }
  0xb1   : > { %v684_v15 = vmul.f32 1.442695, %v668_v10  ;;  %v670_v16 = vsub.f32 0.0, %v654_v12  ;;  %v671_v20 = vsub.f32 0.0, %v655_v14  ;;  %v2384_v28 = vld [vmem:[%s2310_s12 + $0x38] sm:$0xff]  ;;  %v2389_v34 = vld [vmem:[%s2310_s12 + $0x40] sm:$0xff] }
  0xb2   : > { %v686_v19 = vmul.f32 1.442695, %v669_v13  ;;  %v672_v25 = vsub.f32 0.0, %v656_v22  ;;  %v673_v26 = vsub.f32 0.0, %v657_v23  ;;  %v658_v29 = vand.u32 2147483647, %v2381_v27 }
  0xb3   : > { %1665 = vpow2.f32 %v684_v15  ;;  %v688_v21 = vmul.f32 1.442695, %v670_v16  ;;  %v690_v24 = vmul.f32 1.442695, %v671_v20  ;;  %v659_v32 = vand.u32 2147483647, %v2384_v28 }
  0xb4   : > { %1667 = vpow2.f32 %v686_v19  ;;  %v692_v30 = vmul.f32 1.442695, %v672_v25  ;;  %v694_v31 = vmul.f32 1.442695, %v673_v26  ;;  %v674_v33 = vsub.f32 0.0, %v658_v29  ;;  %v2392_v35 = vld [vmem:[%s2310_s12 + $0x48] sm:$0xff] }
  0xb5   : > { %1669 = vpow2.f32 %v688_v21  ;;  %v675_v36 = vsub.f32 0.0, %v659_v32  ;;  %v660_v38 = vand.u32 2147483647, %v2389_v34  ;;  %v661_v39 = vand.u32 2147483647, %v2392_v35  ;;  %v2404_v50 = vld [vmem:[%s2310_s12 + $0x50] sm:$0xff] }
  0xb6   : > { %1671 = vpow2.f32 %v690_v24  ;;  %v696_v37 = vmul.f32 1.442695, %v674_v33  ;;  %v636_v40 = vmax.f32 %v2356_v5, 0.0  ;;  %v637_v41 = vmax.f32 %v2359_v6, 0.0  ;;  %v2407_v51 = vld [vmem:[%s2310_s12 + $0x58] sm:$0xff]  ;;  %v2458_v12 = vld [vmem:[%s2303_s26] sm:$0xff] }
  0xb7   : > { %1673 = vpow2.f32 %v692_v30  ;;  %v698_v42 = vmul.f32 1.442695, %v675_v36  ;;  %v638_v43 = vmax.f32 %v2365_v9, 0.0  ;;  %v639_v44 = vmax.f32 %v2368_v11, 0.0  ;;  %s2696_s15 = sld [smem:[#allocation8 + %s2164_s19]]  ;;  %p1529_p9 = scmp.ge.s32.totalorder %s2164_s19, 2 }
  0xb8   : > { %1675 = vpow2.f32 %v694_v31  ;;  %v640_v45 = vmax.f32 %v2373_v17, 0.0  ;;  %v641_v47 = vmax.f32 %v2376_v18, 0.0  ;;  %v642_v48 = vmax.f32 %v2381_v27, 0.0 }
  0xb9   : > { %1677 = vpow2.f32 %v696_v37  ;;  %v676_v49 = vsub.f32 0.0, %v660_v38  ;;  %v677_v56 = vsub.f32 0.0, %v661_v39  ;;  %v643_v61 = vmax.f32 %v2384_v28, 0.0 }
  0xba   : > { %1679 = vpow2.f32 %v698_v42  ;;  %v662_v0 = vand.u32 2147483647, %v2404_v50  ;;  %v663_v1 = vand.u32 2147483647, %v2407_v51  ;;  %v2477_v42 = vld [vmem:[%s2303_s26 + $0x10] sm:$0xff] }
  0xbb   : > { %v700_v10 = vmul.f32 1.442695, %v676_v49  ;;  %v702_v14 = vmul.f32 1.442695, %v677_v56 }
  0xbd   : > { %v1666_v46 = vpop.eup %1665 }
  0xbe   : > { %v1668_v52 = vpop.eup %1667  ;;  %v716_v53 = vadd.f32 1.0, %v1666_v46  ;;  %v719_v54 = vmul.f32 -0.5, %v1666_v46  ;;  %v722_v55 = vand.u32 2147483647, %v1666_v46 }
  0xbf   : > { %v1670_v57 = vpop.eup %1669  ;;  %v725_v58 = vadd.f32 1.0, %v1668_v52  ;;  %v728_v59 = vmul.f32 -0.5, %v1668_v52  ;;  %v731_v60 = vand.u32 2147483647, %v1668_v52 }
  0xc0   : > { %v1672_v62 = vpop.eup %1671  ;;  %1681 = vlog2.f32 %v716_v53  ;;  %v734_v63 = vadd.f32 1.0, %v1670_v57  ;;  %v720_v7 = vadd.f32 1.0, %v719_v54  ;;  %v737_v8 = vmul.f32 -0.5, %v1670_v57 }
  0xc1   : > { %1683 = vlog2.f32 %v725_v58  ;;  %vm2412_vm2 = vcmp.lt.f32.partialorder %v722_v55, 0.0004427343  ;;  %v743_v13 = vadd.f32 1.0, %v1672_v62  ;;  %v1674_v15 = vpop.eup %1673  ;;  %v729_v16 = vadd.f32 1.0, %v728_v59  ;;  %v2490_v58 = vld [vmem:[%s2303_s26 + $0x18] sm:$0xff] }
  0xc2   : > { %1685 = vlog2.f32 %v734_v63  ;;  %vm2416_vm3 = vcmp.lt.f32.partialorder %v731_v60, 0.0004427343  ;;  %v740_v20 = vand.u32 2147483647, %v1670_v57  ;;  %v746_v21 = vmul.f32 -0.5, %v1672_v62  ;;  %v1676_v22 = vpop.eup %1675 }
  0xc3   : > { %v738_v23 = vadd.f32 1.0, %v737_v8  ;;  %1687 = vlog2.f32 %v743_v13  ;;  %v752_v24 = vadd.f32 1.0, %v1674_v15  ;;  %v755_v25 = vmul.f32 -0.5, %v1674_v15  ;;  %v2420_v32 = vpop.eup %1677 }
  0xc4   : > { %v721_v26 = vmul.f32 %v1666_v46, %v720_v7  ;;  %v747_v29 = vadd.f32 1.0, %v746_v21  ;;  %v749_v30 = vand.u32 2147483647, %v1672_v62  ;;  %v758_v31 = vand.u32 2147483647, %v1674_v15  ;;  %v2422_v38 = vpop.eup %1679 }
  0xc5   : > { %1689 = vlog2.f32 %v752_v24  ;;  %v756_v33 = vadd.f32 1.0, %v755_v25  ;;  %v761_v36 = vadd.f32 1.0, %v1676_v22  ;;  %v764_v37 = vmul.f32 -0.5, %v1676_v22 }
  0xc6   : > { %v730_v39 = vmul.f32 %v1668_v52, %v729_v16  ;;  %vm2424_vm4 = vcmp.lt.f32.partialorder %v740_v20, 0.0004427343  ;;  %v767_v49 = vand.u32 2147483647, %v1676_v22  ;;  %v770_v53 = vadd.f32 1.0, %v2420_v32 }
  0xc7   : > { %v739_v46 = vmul.f32 %v1670_v57, %v738_v23  ;;  %1691 = vlog2.f32 %v761_v36  ;;  %v765_v54 = vadd.f32 1.0, %v764_v37  ;;  %v773_v55 = vmul.f32 -0.5, %v2420_v32  ;;  %v892_v36 = vld [vmem:[%s2316_s28 + $0x8] sm:$0xff] }
  0xc8   : > { %v748_v56 = vmul.f32 %v1672_v62, %v747_v29  ;;  %vm2430_vm5 = vcmp.lt.f32.partialorder %v749_v30, 0.0004427343  ;;  %1693 = vlog2.f32 %v770_v53  ;;  %v779_v52 = vadd.f32 1.0, %v2422_v38  ;;  %v891_v29 = vld [vmem:[%s2316_s28] sm:$0xff] }
  0xc9   : > { %v757_v60 = vmul.f32 %v1674_v15, %v756_v33  ;;  %vm2435_vm6 = vcmp.lt.f32.partialorder %v758_v31, 0.0004427343  ;;  %vm2439_vm7 = vcmp.lt.f32.partialorder %v767_v49, 0.0004427343  ;;  %v774_v7 = vadd.f32 1.0, %v773_v55 }
  0xca   : > { %v1682_v59 = vpop.eup %1681  ;;  %v776_v13 = vand.u32 2147483647, %v2420_v32  ;;  %1695 = vlog2.f32 %v779_v52  ;;  %v678_v16 = vsub.f32 0.0, %v662_v0  ;;  %v766_v15 = vmul.f32 %v1676_v22, %v765_v54 }
  0xcb   : > { %v1684_v62 = vpop.eup %1683  ;;  %v718_v8 = vmul.f32 0.6931472, %v1682_v59  ;;  %v782_v23 = vmul.f32 -0.5, %v2422_v38  ;;  %v785_v24 = vand.u32 2147483647, %v2422_v38  ;;  %1697 = vpow2.f32 %v700_v10 }
  0xcc   : > { %v1686_v20 = vpop.eup %1685  ;;  %v727_v21 = vmul.f32 0.6931472, %v1684_v62  ;;  %v679_v31 = vsub.f32 0.0, %v663_v1  ;;  %v775_v37 = vmul.f32 %v2420_v32, %v774_v7  ;;  %1699 = vpow2.f32 %v702_v14 }
  0xcd   : > { %v724_v25 = vsel %vm2412_vm2, %v721_v26, %v718_v8  ;;  %v736_v30 = vmul.f32 0.6931472, %v1686_v20  ;;  %v1688_v33 = vpop.eup %1687  ;;  %v893_v26 = vld [vmem:[%s2316_s28 + $0x10] sm:$0xff]  ;;  %v704_v5 = vmul.f32 1.442695, %v678_v16  ;;  %v783_v32 = vadd.f32 1.0, %v782_v23 }
  0xce   : > { %v733_v0 = vsel %vm2416_vm3, %v730_v39, %v727_v21  ;;  %v2453_v22 = vadd.f32 %v724_v25, %v636_v40  ;;  %v745_v19 = vmul.f32 0.6931472, %v1688_v33  ;;  %v2468_v39 = vld [vmem:[%s2303_s26 + $0x8] sm:$0xff]  ;;  %v706_v6 = vmul.f32 1.442695, %v679_v31  ;;  %v895_v8 = vld [vmem:[%s2316_s28 + $0x20] sm:$0xff] }
  0xcf   : > { %v2462_v10 = vadd.f32 %v733_v0, %v637_v41  ;;  %v742_v1 = vsel %vm2424_vm4, %v739_v46, %v736_v30  ;;  %v1690_v40 = vpop.eup %1689  ;;  %v894_v46 = vld [vmem:[%s2316_s28 + $0x18] sm:$0xff]  ;;  %1701 = vpow2.f32 %v704_v5  ;;  %vm2495_vm8 = vcmp.lt.f32.partialorder %v776_v13, 0.0004427343  ;;  %v2506_v23 = vld [vmem:[%s2303_s26 + $0x20] sm:$0xff]  ;;  %v896_v25 = vld [vmem:[%s2316_s28 + $0x28] sm:$0xff] }
  0xd0   : > { %v907_v49 = vmul.f32 %v891_v29, %v2453_v22  ;;  %v2473_v14 = vadd.f32 %v742_v1, %v638_v43  ;;  %v751_v53 = vsel %vm2430_vm5, %v748_v56, %v745_v19  ;;  %v754_v54 = vmul.f32 0.6931472, %v1690_v40  ;;  %v2526_v33 = vld [vmem:[%s2310_s12 + $0x60] sm:$0xff]  ;;  %v2532_v0 = vld [vmem:[%s2303_s26 + $0x28] sm:$0xff]  ;;  %v2544_v5 = vld [vmem:[%s2303_s26 + $0x30] sm:$0xff] }
  0xd1   : > { %v908_v41 = vmul.f32 %v892_v36, %v2462_v10  ;;  %v1692_v55 = vpop.eup %1691  ;;  %v2485_v9 = vadd.f32 %v751_v53, %v639_v44  ;;  %1703 = vpow2.f32 %v706_v6  ;;  %v784_v29 = vmul.f32 %v2422_v38, %v783_v32  ;;  %v2529_v38 = vld [vmem:[%s2310_s12 + $0x68] sm:$0xff] }
  0xd2   : > { %v923_v52 = vadd.f32 %v907_v49, %v2458_v12  ;;  %v909_v43 = vmul.f32 %v893_v26, %v2473_v14  ;;  %v1694_v59 = vpop.eup %1693  ;;  %v760_v56 = vsel %vm2435_vm6, %v757_v60, %v754_v54  ;;  %v763_v62 = vmul.f32 0.6931472, %v1692_v55  ;;  %v898_v49 = vld [vmem:[%s2316_s28 + $0x38] sm:$0xff] }
  0xd3   : > { %v924_v7 = vadd.f32 %v908_v41, %v2468_v39  ;;  %v910_v11 = vmul.f32 %v894_v46, %v2485_v9  ;;  %v2503_v20 = vadd.f32 %v760_v56, %v640_v45  ;;  %v772_v21 = vmul.f32 0.6931472, %v1694_v59  ;;  %v2561_v54 = vld [vmem:[%s2303_s26 + $0x38] sm:$0xff] }
  0xd4   : > { %v925_v44 = vadd.f32 %v909_v43, %v2477_v42  ;;  %v1696_v63 = vpop.eup %1695  ;;  %v769_v13 = vsel %vm2439_vm7, %v766_v15, %v763_v62  ;;  %vm2512_vm9 = vcmp.lt.f32.partialorder %v785_v24, 0.0004427343  ;;  %v897_v15 = vld [vmem:[%s2316_s28 + $0x30] sm:$0xff]  ;;  %v665_v32 = vand.u32 2147483647, %v2529_v38 }
  0xd5   : > { %v944_v60 = vpack.c.bf16 %v924_v7, %v923_v52  ;;  %v926_v17 = vadd.f32 %v910_v11, %v2490_v58  ;;  %v2519_v45 = vadd.f32 %v769_v13, %v641_v47  ;;  %v911_v31 = vmul.f32 %v895_v8, %v2503_v20  ;;  %v1698_v24 = vpop.eup %1697  ;;  %v2578_v13 = vld [vmem:[%s2310_s12 + $0x78] sm:$0xff] }
  0xd6   : > { %v778_v57 = vsel %vm2495_vm8, %v775_v37, %v772_v21  ;;  %v781_v36 = vmul.f32 0.6931472, %v1696_v63  ;;  %v2538_v47 = vpop.eup %1699  ;;  %v788_v26 = vadd.f32 1.0, %v1698_v24  ;;  %v791_v55 = vmul.f32 -0.5, %v1698_v24  ;;  %v2573_v21 = vld [vmem:[%s2310_s12 + $0x70] sm:$0xff] }
  0xd7   : > { %1552 = vmatpush3.bf16.msra.mxu0 %v944_v60  ;;  %v2536_v18 = vadd.f32 %v778_v57, %v642_v48  ;;  %v945_v37 = vpack.c.bf16 %v926_v17, %v925_v44  ;;  %v912_v1 = vmul.f32 %v896_v25, %v2519_v45  ;;  %v927_v19 = vadd.f32 %v911_v31, %v2506_v23 }
  0xd8   : > { %1553 = vmatprep.subr.bf16.mxu0 %v2005_v4  ;;  %v787_v40 = vsel %vm2512_vm9, %v784_v29, %v781_v36  ;;  %v664_v48 = vand.u32 2147483647, %v2526_v33  ;;  %1705 = vlog2.f32 %v788_v26  ;;  %v797_v53 = vadd.f32 1.0, %v2538_v47 }
  0xd9   : > { %v913_v27 = vmul.f32 %v897_v15, %v2536_v18  ;;  %v928_v6 = vadd.f32 %v912_v1, %v2532_v0  ;;  %v2555_v41 = vadd.f32 %v787_v40, %v643_v61  ;;  %v2558_v46 = vpop.eup %1701  ;;  %v800_v61 = vmul.f32 -0.5, %v2538_v47  ;;  %v902_v1 = vld [vmem:[%s2316_s28 + $0x58] sm:$0xff] }
  0xda   : > { %1707 = vlog2.f32 %v797_v53  ;;  %v806_v7 = vadd.f32 1.0, %v2558_v46  ;;  %v680_v56 = vsub.f32 0.0, %v664_v48  ;;  %v681_v62 = vsub.f32 0.0, %v665_v32 }
  0xdb   : > { %1554 = vmatpush3.bf16.msra.mxu0 %v945_v37  ;;  %v2563_v52 = vpop.eup %1703  ;;  %v946_v43 = vpack.c.bf16 %v928_v6, %v927_v19  ;;  %v914_v59 = vmul.f32 %v898_v49, %v2555_v41  ;;  %v929_v28 = vadd.f32 %v913_v27, %v2544_v5  ;;  %v792_v11 = vadd.f32 1.0, %v791_v55 }
  0xdc   : > { %1555 = vmatprep.subr.bf16.mxu0 %v2005_v4  ;;  %v815_v16 = vadd.f32 1.0, %v2563_v52  ;;  %v794_v44 = vand.u32 2147483647, %v1698_v24  ;;  %1709 = vlog2.f32 %v806_v7  ;;  %v809_v60 = vmul.f32 -0.5, %v2558_v46 }
  0xdd   : > { %v930_v8 = vadd.f32 %v914_v59, %v2561_v54  ;;  %v801_v25 = vadd.f32 1.0, %v800_v61  ;;  %v818_v29 = vmul.f32 -0.5, %v2563_v52  ;;  %v708_v30 = vmul.f32 1.442695, %v680_v56 }
  0xde   : > { %1711 = vlog2.f32 %v815_v16  ;;  %v710_v17 = vmul.f32 1.442695, %v681_v62  ;;  %v644_v31 = vmax.f32 %v2389_v34, 0.0  ;;  %v645_v57 = vmax.f32 %v2392_v35, 0.0  ;;  %v2607_v16 = vld [vmem:[%s2303_s26 + $0x40] sm:$0xff] }
  0xdf   : > { %1556 = vmatpush3.bf16.msra.mxu0 %v946_v43  ;;  %v947_v63 = vpack.c.bf16 %v930_v8, %v929_v28  ;;  %v803_v15 = vand.u32 2147483647, %v2538_v47  ;;  %v666_v36 = vand.u32 2147483647, %v2573_v21  ;;  %v793_v37 = vmul.f32 %v1698_v24, %v792_v11  ;;  %v899_v28 = vld [vmem:[%s2316_s28 + $0x40] sm:$0xff] }
  0xe0   : > { %1557 = vmatprep.subr.bf16.mxu0 %v2005_v4  ;;  %vm2585_vm10 = vcmp.lt.f32.partialorder %v794_v44, 0.0004427343  ;;  %1713 = vpow2.f32 %v708_v30  ;;  %v667_v19 = vand.u32 2147483647, %v2578_v13  ;;  %v810_v34 = vadd.f32 1.0, %v809_v60  ;;  %v900_v44 = vld [vmem:[%s2316_s28 + $0x48] sm:$0xff] }
  0xe1   : > { %v812_v35 = vand.u32 2147483647, %v2558_v46  ;;  %1715 = vpow2.f32 %v710_v17  ;;  %v682_v40 = vsub.f32 0.0, %v666_v36  ;;  %v802_v27 = vmul.f32 %v2538_v47, %v801_v25 }
  0xe2   : > { %v1706_v26 = vpop.eup %1705  ;;  %v819_v24 = vadd.f32 1.0, %v818_v29  ;;  %v683_v48 = vsub.f32 0.0, %v667_v19  ;;  %vm2593_vm11 = vcmp.lt.f32.partialorder %v803_v15, 0.0004427343  ;;  %v821_v53 = vand.u32 2147483647, %v2563_v52 }
  0xe3   : > { %1558 = vmatpush3.bf16.msra.mxu0 %v947_v63  ;;  %v790_v49 = vmul.f32 0.6931472, %v1706_v26  ;;  %v712_v55 = vmul.f32 1.442695, %v682_v40  ;;  %v646_v61 = vmax.f32 %v2404_v50, 0.0  ;;  %v647_v56 = vmax.f32 %v2407_v51, 0.0 }
  0xe4   : > { %1559 = vmatprep.subr.bf16.mxu0 %v2005_v4  ;;  %v1708_v32 = vpop.eup %1707  ;;  %v714_v47 = vmul.f32 1.442695, %v683_v48  ;;  %v811_v62 = vmul.f32 %v2558_v46, %v810_v34  ;;  %vm2612_vm12 = vcmp.lt.f32.partialorder %v812_v35, 0.0004427343  ;;  %v820_v50 = vmul.f32 %v2563_v52, %v819_v24  ;;  %v2621_v29 = vld [vmem:[%s2303_s26 + $0x48] sm:$0xff]  ;;  %v901_v15 = vld [vmem:[%s2316_s28 + $0x50] sm:$0xff] }
  0xe5   : > { %v796_v43 = vsel %vm2585_vm10, %v793_v37, %v790_v49  ;;  %v799_v59 = vmul.f32 0.6931472, %v1708_v32  ;;  %1717 = vpow2.f32 %v712_v55  ;;  %vm822_vm13 = vcmp.lt.f32.partialorder %v821_v53, 0.0004427343  ;;  %v2633_v34 = vld [vmem:[%s2303_s26 + $0x50] sm:$0xff]  ;;  %v2638_v49 = vld [vmem:[%s2303_s26 + $0x58] sm:$0xff] }
  0xe6   : > { %v2602_v7 = vadd.f32 %v796_v43, %v644_v31  ;;  %v1710_v8 = vpop.eup %1709  ;;  %1719 = vpow2.f32 %v714_v47 }
  0xe7   : > { %v805_v11 = vsel %vm2593_vm11, %v802_v27, %v799_v59  ;;  %v808_v25 = vmul.f32 0.6931472, %v1710_v8 }
  0xe8   : > { %v1712_v51 = vpop.eup %1711  ;;  %v2617_v60 = vadd.f32 %v805_v11, %v645_v57  ;;  %v915_v46 = vmul.f32 %v899_v28, %v2602_v7 }
  0xe9   : > { %v817_v30 = vmul.f32 0.6931472, %v1712_v51  ;;  %v814_v52 = vsel %vm2612_vm12, %v811_v62, %v808_v25  ;;  %v648_v51 = vmax.f32 %v2526_v33, 0.0 }
  0xea   : > { %v916_v17 = vmul.f32 %v900_v44, %v2617_v60  ;;  %v931_v31 = vadd.f32 %v915_v46, %v2607_v16  ;;  %v1714_v36 = vpop.eup %1713  ;;  %v2628_v37 = vadd.f32 %v814_v52, %v646_v61 }
  0xeb   : > { %v823_v57 = vsel %vm822_vm13, %v820_v50, %v817_v30  ;;  %v1716_v19 = vpop.eup %1715  ;;  %v824_v40 = vadd.f32 1.0, %v1714_v36  ;;  %v827_v53 = vmul.f32 -0.5, %v1714_v36  ;;  %v830_v8 = vand.u32 2147483647, %v1714_v36 }
  0xec   : > { %v932_v26 = vadd.f32 %v916_v17, %v2621_v29  ;;  %v2635_v35 = vadd.f32 %v823_v57, %v647_v56  ;;  %v917_v27 = vmul.f32 %v901_v15, %v2628_v37  ;;  %v833_v24 = vadd.f32 1.0, %v1716_v19 }
  0xed   : > { %1721 = vlog2.f32 %v824_v40  ;;  %v836_v59 = vmul.f32 -0.5, %v1716_v19  ;;  %v828_v62 = vadd.f32 1.0, %v827_v53  ;;  %v839_v63 = vand.u32 2147483647, %v1716_v19 }
  0xee   : > { %v948_v48 = vpack.c.bf16 %v932_v26, %v931_v31  ;;  %v918_v32 = vmul.f32 %v902_v1, %v2635_v35  ;;  %v933_v6 = vadd.f32 %v917_v27, %v2633_v34  ;;  %1723 = vlog2.f32 %v833_v24  ;;  %v903_v24 = vld [vmem:[%s2316_s28 + $0x60] sm:$0xff] }
  0xef   : > { %v1718_v55 = vpop.eup %1717  ;;  %v837_v11 = vadd.f32 1.0, %v836_v59  ;;  %v829_v46 = vmul.f32 %v1714_v36, %v828_v62  ;;  %vm831_vm14 = vcmp.lt.f32.partialorder %v830_v8, 0.0004427343  ;;  %v649_v15 = vmax.f32 %v2529_v38, 0.0 }
  0xf0   : > { %1560 = vmatpush3.bf16.msra.mxu0 %v948_v48  ;;  %v934_v43 = vadd.f32 %v918_v32, %v2638_v49  ;;  %v1720_v28 = vpop.eup %1719  ;;  %v842_v61 = vadd.f32 1.0, %v1718_v55  ;;  %v845_v44 = vmul.f32 -0.5, %v1718_v55  ;;  %v848_v31 = vand.u32 2147483647, %v1718_v55  ;;  %v904_v48 = vld [vmem:[%s2316_s28 + $0x68] sm:$0xff] }
  0xf1   : > { %1561 = vmatprep.subr.bf16.mxu0 %v2005_v4  ;;  %v851_v56 = vadd.f32 1.0, %v1720_v28  ;;  %v854_v50 = vmul.f32 -0.5, %v1720_v28  ;;  %v838_v30 = vmul.f32 %v1716_v19, %v837_v11  ;;  %vm840_vm15 = vcmp.lt.f32.partialorder %v839_v63, 0.0004427343 }
  0xf2   : > { %v949_v47 = vpack.c.bf16 %v934_v43, %v933_v6  ;;  %1725 = vlog2.f32 %v842_v61  ;;  %v846_v17 = vadd.f32 1.0, %v845_v44  ;;  %v857_v40 = vand.u32 2147483647, %v1720_v28  ;;  %v2653_v6 = vld [vmem:[%s2303_s26 + $0x60] sm:$0xff]  ;;  %v2659_v61 = vld [vmem:[%s2303_s26 + $0x68] sm:$0xff]  ;;  %v905_v44 = vld [vmem:[%s2316_s28 + $0x70] sm:$0xff] }
  0xf3   : > { %1727 = vlog2.f32 %v851_v56  ;;  %v855_v1 = vadd.f32 1.0, %v854_v50  ;;  %v650_v38 = vmax.f32 %v2573_v21, 0.0  ;;  %vm849_vm0 = vcmp.lt.f32.partialorder %v848_v31, 0.0004427343 }
  0xf4   : > { %1562 = vmatpush3.bf16.msra.mxu0 %v949_v47  ;;  %v847_v32 = vmul.f32 %v1718_v55, %v846_v17  ;;  %v651_v55 = vmax.f32 %v2578_v13, 0.0  ;;  %vm858_vm1 = vcmp.lt.f32.partialorder %v857_v40, 0.0004427343  ;;  %v633_v40 = vld [vmem:[%s579_s25] sm:$0x1] }
  0xf5   : > { %1563 = vmatprep.subr.bf16.mxu0 %v2005_v4  ;;  %v856_v43 = vmul.f32 %v1720_v28, %v855_v1 }
  0xf7   : > { %v1722_v25 = vpop.eup %1721 }
  0xf8   : > { %v1724_v52 = vpop.eup %1723  ;;  %v826_v57 = vmul.f32 0.6931472, %v1722_v25 }
  0xf9   : > { %v835_v26 = vmul.f32 0.6931472, %v1724_v52 }
  0xfa   : > { %v832_v27 = vsel %vm831_vm14, %v829_v46, %v826_v57  ;;  %v2671_v46 = vld [vmem:[%s2303_s26 + $0x70] sm:$0xff] }
  0xfb   : > { %v841_v33 = vsel %vm840_vm15, %v838_v30, %v835_v26  ;;  %v2649_v36 = vadd.f32 %v832_v27, %v648_v51  ;;  %v906_v51 = vld [vmem:[%s2316_s28 + $0x78] sm:$0xff]  ;;  %v877_v27 = vand.u32 2147483647, %v633_v40 }
  0xfc   : > { %v1726_v19 = vpop.eup %1725  ;;  %v2655_v53 = vadd.f32 %v841_v33, %v649_v15  ;;  %v2676_v30 = vld [vmem:[%s2303_s26 + $0x78] sm:$0xff] }
  0xfd   : > { %v1728_v59 = vpop.eup %1727  ;;  %v919_v47 = vmul.f32 %v903_v24, %v2649_v36  ;;  %v844_v56 = vmul.f32 0.6931472, %v1726_v19  ;;  %3229 = vst [vmem:[#allocation28_spill] sm:$0xff] %v2676_v30  ;;  %v942_v57 = vld [vmem:[#allocation2] sm:$0xff]  ;;  %v878_v24 = vsub.f32 0.0, %v877_v27 }
  0xfe   : > { %v920_v62 = vmul.f32 %v904_v48, %v2655_v53  ;;  %v853_v8 = vmul.f32 0.6931472, %v1728_v59  ;;  %v943_v26 = vpack.c.bf16 %v942_v57, %v942_v57 }
  0xff   : > { %v935_v11 = vadd.f32 %v919_v47, %v2653_v6  ;;  %v850_v21 = vsel %vm849_vm0, %v847_v32, %v844_v56  ;;  %v879_v33 = vmul.f32 1.442695, %v878_v24 }
 0x100   : > { %v936_v28 = vadd.f32 %v920_v62, %v2659_v61  ;;  %v859_v63 = vsel %vm858_vm1, %v856_v43, %v853_v8  ;;  %v2667_v50 = vadd.f32 %v850_v21, %v650_v38  ;;  %v953_v8 = vlaneseq }
 0x101   : > { %v2673_v25 = vadd.f32 %v859_v63, %v651_v55  ;;  %1729 = vpow2.f32 %v879_v33  ;;  %v876_v55 = vmax.f32 %v633_v40, 0.0 }
 0x102   : > { %v950_v13 = vpack.c.bf16 %v936_v28, %v935_v11  ;;  %v921_v17 = vmul.f32 %v905_v44, %v2667_v50  ;;  %v939_v11 = vld [vmem:[%s582_s23] sm:$0x1]  ;;  %v2699_v44 = vshrl.u32 %v953_v8, 7 }
 0x103   : > { %v922_v31 = vmul.f32 %v906_v51, %v2673_v25  ;;  %v632_v28 = vld [vmem:[%s576_s27] sm:$0x1] }
 0x104   : > { %1564 = vmatpush3.bf16.msra.mxu0 %v950_v13  ;;  %v937_v52 = vadd.f32 %v921_v17, %v2671_v46  ;;  %v2707_v51 = vsub.s32 0, %v2699_v44  ;;  %v999_v13 = vand.u32 127, %v953_v8 }
 0x105   : > { %1565 = vmatprep.subr.bf16.mxu0 %v2005_v4  ;;  %v938_v15 = vadd.f32 %v922_v31, %v2676_v30  ;;  %v1000_v31 = vstv %s2696_s15 }
 0x106   : > { %vm2711_vm3 = vcmp.lt.s32.totalorder %v999_v13, %v1000_v31 }
 0x107   : > { %v951_v1 = vpack.c.bf16 %v938_v15, %v937_v52 }
 0x109   : > { %1566 = vmatpush3.bf16.msra.mxu0 %v951_v1 }
 0x10b   : > { %v1730_v48 = vpop.eup %1729 }
 0x10c   : > { %1568 = vmatmul.mubr.bf16.vlgmr.msra.gmra.mrb[0].mxu0 %v943_v26  ;;  %v881_v4 = vadd.f32 1.0, %v1730_v48  ;;  %v884_v32 = vmul.f32 -0.5, %v1730_v48  ;;  %v887_v43 = vand.u32 2147483647, %v1730_v48 }
 0x10e   : > { %1731 = vlog2.f32 %v881_v4  ;;  %v885_v19 = vadd.f32 1.0, %v884_v32  ;;  %vm888_vm2 = vcmp.lt.f32.partialorder %v887_v43, 0.0004427343 }
 0x110   : > { %v886_v47 = vmul.f32 %v1730_v48, %v885_v19 }
 0x118   : > { %v1732_v38 = vpop.eup %1731 }
 0x119   : > { %v883_v59 = vmul.f32 0.6931472, %v1732_v38 }
 0x11b   : > { %v889_v56 = vsel %vm888_vm2, %v886_v47, %v883_v59 }
 0x11c   : > { %v2688_v62 = vadd.f32 %v889_v56, %v876_v55 }
 0x11e   : > { %v940_v21 = vmul.f32 %v939_v11, %v2688_v62 }
 0x120   : > { %v941_v63 = vadd.f32 %v940_v21, %v632_v28 }
 0x122   : > { %v956_v17 = vrot.slane %v941_v63, %v2707_v51 }
 0x1dd   : > { %1007 = sbr.rel (%p1529_p9) target bundleno = 494 (0x1ee), region = 92 }
 0x1df   : > { %v992_v52 = vpop.f32.mrb[0].mxu0 }
 0x1e0   : > { %v993_v57 = vadd.f32 %v992_v52, %v956_v17  ;;  %v1569_v1 = vpop.f32.mrb[1].mxu0 }
 0x1e1   : > { %v995_v26 = vpop.f32.mrb[2].mxu0 }
 0x1e2   : > { %v1002_v40 = vsel %vm2711_vm3, %v993_v57, 0.0  ;;  %v1570_v27 = vpop.f32.mrb[3].mxu0 }
 0x1e3   : > { %1003 = vst [vmem:[#allocation2] sm:$0xff] %v1002_v40 }
 0x1ea   : > { %v1008_v24 = vld [vmem:[#allocation2] sm:$0xff] }
 0x1eb   : > { %v1009_v33 = vmax.f32 %v1008_v24, 0.0 }
 0x1ed   : > { %1010 = vst [vmem:[#allocation2] sm:$0xff] %v1009_v33 }
 0x1ee PF: > { %p1530_p13 = scmp.ne.s32.totalorder %s2164_s19, 2 }
 0x1f0   : > { %1014 = sbr.rel (%p1530_p13) target bundleno = 503 (0x1f7), region = 96 }
 0x1f4   : > { %v1015_v48 = vld [vmem:[#allocation2] sm:$0xff] (!%p1530_p13) }
 0x1f5   : > { %1016 = vst [vmem:[#allocation14] sm:$0xff] (!%p1530_p13), %v1015_v48 }
 0x1f7 PF: > { %v1095_v4 = vrot.slane %v2350_v2, %v2707_v51  ;;  %v1017_v32 = vmul.f32 1.442695, %v2352_v3  ;;  %v2007_v19 = vmov 0   ;;  %v1075_v8 = vmul.f32 %v2453_v22, %v2453_v22  ;;  %s1072_s20 = smul.u32 %s2696_s15, %s2348_s13  ;;  %s1074_s2 = scvt.s32.f32 %s2696_s15 }
 0x1f8   : > { %1733 = vset.pattern.permute.xlu0 %v2007_v19  ;;  %1734 = vset.pattern.permute.xlu1 %v2007_v19  ;;  %v1076_v11 = vmul.f32 %v2462_v10, %v2462_v10  ;;  %v2736_v21 = vmul.f32 %v2473_v14, %v2473_v14  ;;  %v2743_v13 = vmul.f32 %v2485_v9, %v2485_v9  ;;  %v2784_v27 = vadd.s32 8, %v2699_v44 }
 0x1f9   : > { %1097 = vperm.xlu0 %1733, %v1095_v4   ;;  %1735 = vpow2.f32 %v1017_v32  ;;  %1264 = vperm.xlu1 %1734, %v2350_v2   ;;  %v2747_v17 = vmul.f32 %v2503_v20, %v2503_v20  ;;  %v2763_v52 = vmul.f32 %v2602_v7, %v2602_v7  ;;  %v2767_v57 = vmul.f32 %v2617_v60, %v2617_v60  ;;  %s1073_s27 = scvt.s32.f32 %s1072_s20 }
 0x1fa   : > { %v1262_v1 = vmul.f32 %v2688_v62, %v2688_v62  ;;  %v2773_v26 = vmul.f32 %v2628_v37, %v2628_v37  ;;  %v2781_v40 = vmul.f32 %v2649_v36, %v2649_v36  ;;  %v2787_v24 = vadd.s32 16, %v2699_v44 }
 0x1fb   : > { %v2794_v48 = vadd.s32 24, %v2699_v44  ;;  %v2797_v4 = vadd.s32 32, %v2699_v44  ;;  %v2800_v32 = vadd.s32 40, %v2699_v44  ;;  %v2803_v19 = vadd.s32 48, %v2699_v44  ;;  %s1300_s23 = sadd.f32 %s1074_s2, %s1073_s27 }
 0x1fc   : > { %3233 = vst [vmem:[#allocation30_spill] sm:$0xff] %v2781_v40  ;;  %vm1287_vm4 = vcmask 1040384   ;;  %v2826_v40 = vadd.s32 96, %v2699_v44 }
 0x1fe   : > { %3236 = vst [vmem:[#allocation33_spill] sm:$0xff] %v2826_v40 }
 0x203   : > { %v1736_v38 = vpop.eup %1735 }
 0x204   : > { %1737 = vrcp.f32 %v1736_v38 }
 0x205   : > { %1739 = vlog2.f32 %v2453_v22  ;;  %v2751_v22 = vmul.f32 %v2519_v45, %v2519_v45 }
 0x206   : > { %1741 = vlog2.f32 %v2688_v62 }
 0x207   : > { %1743 = vlog2.f32 %v2462_v10  ;;  %v2755_v10 = vmul.f32 %v2536_v18, %v2536_v18 }
 0x208   : > { %1745 = vlog2.f32 %v2473_v14  ;;  %v2759_v14 = vmul.f32 %v2555_v41, %v2555_v41 }
 0x209   : > { %1747 = vlog2.f32 %v2485_v9 }
 0x20a   : > { %1749 = vlog2.f32 %v2503_v20  ;;  %v2834_v20 = vmul.f32 %v2655_v53, %v2655_v53 }
 0x20b   : > { %1751 = vlog2.f32 %v2519_v45 }
 0x20c   : > { %1753 = vlog2.f32 %v2536_v18  ;;  %3237 = vst [vmem:[#allocation34_spill] sm:$0xff] %v2834_v20 }
 0x20d   : > { %1755 = vlog2.f32 %v2555_v41 }
 0x20e   : > { %v1738_v43 = vpop.eup %1737  ;;  %1757 = vlog2.f32 %v2602_v7 }
 0x20f   : > { %v1020_v59 = vmul.f32 0.5, %v1738_v43  ;;  %v2806_v43 = vadd.s32 56, %v2699_v44  ;;  %1759 = vlog2.f32 %v2617_v60 }
 0x210   : > { %1761 = vlog2.f32 %v2628_v37 }
 0x211   : > { %v1152_v47 = vrot.slane %v1020_v59, %v2707_v51  ;;  %1275 = vperm.xlu1 %1734, %v1020_v59   ;;  %v2813_v59 = vadd.s32 72, %v2699_v44  ;;  %1763 = vlog2.f32 %v2635_v35 }
 0x212   : > { %1765 = vlog2.f32 %v2649_v36 }
 0x213   : > { %1154 = vperm.xlu0 %1733, %v1152_v47   ;;  %v2816_v47 = vadd.s32 80, %v2699_v44  ;;  %1767 = vlog2.f32 %v2655_v53 }
 0x214   : > { %1769 = vlog2.f32 %v2667_v50 }
 0x215   : > { %3234 = vst [vmem:[#allocation31_spill] sm:$0xff] %v2816_v47 }
 0x278   : > { %v1265_v55 = vpop.permute.xlu1 %1264  ;;  %v2739_v63 = vpop.permute.xlu0 %1097 }
 0x279   : > { %v1270_v56 = vrot.slane %v1265_v55, %v2707_v51  ;;  %v1100_v62 = vsub.f32 %v2458_v12, %v2739_v63  ;;  %v1101_v33 = vsub.f32 %v2468_v39, %v2739_v63  ;;  %v2809_v12 = vadd.s32 64, %v2699_v44  ;;  %v1740_v39 = vpop.eup %1739 }
 0x27a   : > { %v2819_v55 = vadd.s32 88, %v2699_v44  ;;  %v1104_v18 = vsub.f32 %v2506_v23, %v2739_v63  ;;  %v1105_v23 = vsub.f32 %v2532_v0, %v2739_v63  ;;  %1771 = vlog2.f32 %v2673_v25 }
 0x27b   : > { %v1271_v31 = vsub.f32 %v632_v28, %v1270_v56  ;;  %v2777_v28 = vmul.f32 %v2635_v35, %v2635_v35  ;;  %v1742_v56 = vpop.eup %1741  ;;  %v1116_v2 = vmul.f32 %v1100_v62, %v1100_v62  ;;  %v1117_v3 = vmul.f32 %v1101_v33, %v1101_v33 }
 0x27c   : > { %3235 = vst [vmem:[#allocation32_spill] sm:$0xff] %v2819_v55  ;;  %v1744_v9 = vpop.eup %1743  ;;  %v1284_v62 = vmul.f32 0.6931472, %v1742_v56  ;;  %v2841_v33 = vmul.f32 %v2667_v50, %v2667_v50  ;;  %v1107_v35 = vsub.f32 %v2561_v54, %v2739_v63 }
 0x27d   : > { %3232 = vst [vmem:[#allocation29_spill] sm:$0xff] %v2777_v28  ;;  %v1272_v38 = vmul.f32 %v1271_v31, %v1271_v31  ;;  %v1102_v31 = vsub.f32 %v2477_v42, %v2739_v63  ;;  %v2829_v28 = vstv %s2348_s13  ;;  %v1746_v55 = vpop.eup %1745  ;;  %v1103_v42 = vsub.f32 %v2490_v58, %v2739_v63 }
 0x27e   : > { %v1132_v40 = vadd.f32 %v1116_v2, %v1075_v8  ;;  %v1133_v20 = vadd.f32 %v1117_v3, %v1076_v11  ;;  %vm1040_vm5 = vcmp.lt.s32.totalorder %v2699_v44, %v2829_v28  ;;  %vm1041_vm6 = vcmp.lt.s32.totalorder %v2784_v27, %v2829_v28  ;;  %v1748_v8 = vpop.eup %1747 }
 0x27f   : > { %v1273_v47 = vadd.f32 %v1272_v38, %v1262_v1  ;;  %v1118_v38 = vmul.f32 %v1102_v31, %v1102_v31  ;;  %v1174_v58 = vmul.f32 0.6931472, %v1740_v39  ;;  %v1119_v7 = vmul.f32 %v1103_v42, %v1103_v42  ;;  %v1750_v56 = vpop.eup %1749  ;;  %vm2882_vm9 = vmand %vm1040_vm5, %vm2711_vm3 }
 0x280   : > { %v1106_v2 = vsub.f32 %v2544_v5, %v2739_v63  ;;  %v1120_v3 = vmul.f32 %v1104_v18, %v1104_v18  ;;  %vm1042_vm7 = vcmp.lt.s32.totalorder %v2787_v24, %v2829_v28  ;;  %vm1043_vm8 = vcmp.lt.s32.totalorder %v2794_v48, %v2829_v28  ;;  %v1752_v5 = vpop.eup %1751  ;;  %vm2897_vm12 = vmand %vm1041_vm6, %vm2711_vm3 }
 0x281   : > { %v1134_v39 = vadd.f32 %v1118_v38, %v2736_v21  ;;  %v1178_v0 = vmul.f32 0.6931472, %v1746_v55  ;;  %v1121_v21 = vmul.f32 %v1105_v23, %v1105_v23  ;;  %v1754_v31 = vpop.eup %1753  ;;  %vm1044_vm10 = vcmp.lt.s32.totalorder %v2797_v4, %v2829_v28  ;;  %vm2925_vm15 = vmand %vm1042_vm7, %vm2711_vm3 }
 0x282   : > { %v1122_v42 = vmul.f32 %v1106_v2, %v1106_v2  ;;  %v1756_v36 = vpop.eup %1755  ;;  %vm1045_vm11 = vcmp.lt.s32.totalorder %v2800_v32, %v2829_v28  ;;  %vm1046_vm13 = vcmp.lt.s32.totalorder %v2803_v19, %v2829_v28  ;;  %v1109_v18 = vsub.f32 %v2621_v29, %v2739_v63  ;;  %vm2941_vm1 = vmand %vm1043_vm8, %vm2711_vm3  ;;  %v3254_v19 = vld [vmem:[#allocation31_spill] sm:$0xff] }
 0x283   : > { %v1137_v38 = vadd.f32 %v1121_v21, %v2751_v22  ;;  %v1110_v27 = vsub.f32 %v2633_v34, %v2739_v63  ;;  %v1182_v2 = vmul.f32 0.6931472, %v1750_v56  ;;  %vm1047_vm14 = vcmp.lt.s32.totalorder %v2806_v43, %v2829_v28  ;;  %vm2973_vm5 = vmand %vm1045_vm11, %vm2711_vm3 }
 0x284   : > { %vm1048_vm0 = vcmp.lt.s32.totalorder %v2809_v12, %v2829_v28  ;;  %vm1049_vm2 = vcmp.lt.s32.totalorder %v2813_v59, %v2829_v28  ;;  %vm2988_vm6 = vmand %vm1046_vm13, %vm2711_vm3  ;;  %vm1050_vm7 = vcmp.lt.s32.totalorder %v3254_v19, %v2829_v28  ;;  %v1036_v12 = vadd.s32 104, %v2699_v44 }
 0x285   : > { %vm3005_vm8 = vmand %vm1047_vm14, %vm2711_vm3 }
 0x286   : > { %vm1065_vm11 = vmand %vm1049_vm2, %vm2711_vm3  ;;  %vm1053_vm14 = vcmp.lt.s32.totalorder %v1036_v12, %v2829_v28 }
 0x287   : > { %vm1066_vm13 = vmand %vm1050_vm7, %vm2711_vm3 }
 0x288   : > { %vm1069_vm2 = vmand %vm1053_vm14, %vm2711_vm3 }
 0x290   : > { %v1276_v45 = vpop.permute.xlu1 %1275 }
 0x291   : > { %v1281_v1 = vrot.slane %v1276_v45, %v2707_v51  ;;  %v1176_v51 = vmul.f32 0.6931472, %v1744_v9 }
 0x292   : > { %v2847_v30 = vpop.permute.xlu0 %1154 }
 0x293   : > { %v1282_v41 = vmul.f32 %v1281_v1, %v1273_v47  ;;  %v1157_v60 = vmul.f32 %v2847_v30, %v1132_v40  ;;  %v1158_v47 = vmul.f32 %v2847_v30, %v1133_v20  ;;  %v1135_v40 = vadd.f32 %v1119_v7, %v2743_v13 }
 0x294   : > { %v1108_v20 = vsub.f32 %v2607_v16, %v2739_v63  ;;  %v1136_v13 = vadd.f32 %v1120_v3, %v2747_v17  ;;  %v1159_v55 = vmul.f32 %v2847_v30, %v1134_v39  ;;  %v1180_v17 = vmul.f32 0.6931472, %v1748_v8 }
 0x295   : > { %v1285_v11 = vsub.f32 %v1282_v41, %v1284_v62  ;;  %v1205_v45 = vsub.f32 %v1157_v60, %v1174_v58  ;;  %v1206_v16 = vsub.f32 %v1158_v47, %v1176_v51  ;;  %v1758_v62 = vpop.eup %1757  ;;  %v1123_v1 = vmul.f32 %v1107_v35, %v1107_v35 }
 0x296   : > { %v1160_v58 = vmul.f32 %v2847_v30, %v1135_v40  ;;  %v1760_v41 = vpop.eup %1759  ;;  %v1124_v23 = vmul.f32 %v1108_v20, %v1108_v20  ;;  %v1138_v7 = vadd.f32 %v1122_v42, %v2755_v10  ;;  %v1161_v3 = vmul.f32 %v2847_v30, %v1136_v13 }
 0x297   : > { %v1286_v37 = vsel %vm2711_vm3, %v1285_v11, 0.0  ;;  %v1762_v50 = vpop.eup %1761  ;;  %v1207_v51 = vsub.f32 %v1159_v55, %v1178_v0  ;;  %v1221_v29 = vsel %vm2882_vm9, %v1205_v45, 0.0  ;;  %v1222_v22 = vsel %vm2897_vm12, %v1206_v16, 0.0  ;;  %vm3018_vm9 = vmand %vm1048_vm0, %vm2711_vm3 }
 0x298   : > { %v1288_v9 = vsel %vm1287_vm4, %v1286_v37, 0.0  ;;  %v2916_v8 = vpop.eup %1763  ;;  %v1111_v10 = vsub.f32 %v2638_v49, %v2739_v63  ;;  %v1184_v11 = vmul.f32 0.6931472, %v1752_v5  ;;  %v1125_v39 = vmul.f32 %v1109_v18, %v1109_v18  ;;  %vm2958_vm4 = vmand %vm1044_vm10, %vm2711_vm3 }
 0x299   : > { %1289 = vadd.xlane.f32.xlu1 %v1288_v9  ;;  %v1139_v60 = vadd.f32 %v1123_v1, %v2759_v14  ;;  %v1162_v47 = vmul.f32 %v2847_v30, %v1137_v38  ;;  %v1208_v56 = vsub.f32 %v1160_v58, %v1180_v17  ;;  %v1766_v24 = vpop.eup %1765  ;;  %v1112_v0 = vsub.f32 %v2653_v6, %v2739_v63 }
 0x29a   : > { %v1126_v5 = vmul.f32 %v1110_v27, %v1110_v27  ;;  %v1186_v37 = vmul.f32 0.6931472, %v1754_v31  ;;  %v1237_v35 = vadd.f32 %v1222_v22, %v1221_v29  ;;  %v1140_v14 = vadd.f32 %v1124_v23, %v2763_v52  ;;  %v1768_v9 = vpop.eup %1767  ;;  %v3253_v23 = vld [vmem:[#allocation29_spill] sm:$0xff] }
 0x29b   : > { %v1163_v21 = vmul.f32 %v2847_v30, %v1138_v7  ;;  %v1209_v40 = vsub.f32 %v1161_v3, %v1182_v2  ;;  %v1223_v48 = vsel %vm2925_vm15, %v1207_v51, 0.0  ;;  %v1113_v31 = vsub.f32 %v2659_v61, %v2739_v63  ;;  %v1770_v16 = vpop.eup %1769 }
 0x29c   : > { %v1127_v52 = vmul.f32 %v1111_v10, %v1111_v10  ;;  %v1188_v20 = vmul.f32 0.6931472, %v1756_v36  ;;  %v1238_v42 = vadd.f32 %v1237_v35, %v1223_v48  ;;  %v1141_v54 = vadd.f32 %v1125_v39, %v2767_v57  ;;  %v1772_v29 = vpop.eup %1771  ;;  %v3257_v10 = vld [vmem:[#allocation30_spill] sm:$0xff] }
 0x29d   : > { %v1164_v13 = vmul.f32 %v2847_v30, %v1139_v60  ;;  %v1210_v55 = vsub.f32 %v1162_v47, %v1184_v11  ;;  %v1224_v45 = vsel %vm2941_vm1, %v1208_v56, 0.0  ;;  %v1114_v61 = vsub.f32 %v2671_v46, %v2739_v63  ;;  %v3252_v46 = vld [vmem:[#allocation28_spill] sm:$0xff] }
 0x29e   : > { %v1128_v57 = vmul.f32 %v1112_v0, %v1112_v0  ;;  %v1190_v36 = vmul.f32 0.6931472, %v1758_v62  ;;  %v1239_v53 = vadd.f32 %v1238_v42, %v1224_v45  ;;  %v1142_v17 = vadd.f32 %v1126_v5, %v2773_v26  ;;  %v3260_v5 = vld [vmem:[#allocation34_spill] sm:$0xff]  ;;  %v3262_v42 = vld [vmem:[#allocation33_spill] sm:$0xff] }
 0x29f   : > { %v1165_v18 = vmul.f32 %v2847_v30, %v1140_v14  ;;  %v1211_v1 = vsub.f32 %v1163_v21, %v1186_v37  ;;  %v1225_v38 = vsel %vm2958_vm4, %v1209_v40, 0.0  ;;  %v1115_v62 = vsub.f32 %v3252_v46, %v2739_v63  ;;  %v3261_v40 = vld [vmem:[#allocation32_spill] sm:$0xff] }
 0x2a0   : > { %v1129_v58 = vmul.f32 %v1113_v31, %v1113_v31  ;;  %v1192_v26 = vmul.f32 0.6931472, %v1760_v41  ;;  %v1240_v27 = vadd.f32 %v1239_v53, %v1225_v38  ;;  %v1143_v7 = vadd.f32 %v1127_v52, %v3253_v23 }
 0x2a1   : > { %v1166_v2 = vmul.f32 %v2847_v30, %v1141_v54  ;;  %v1212_v3 = vsub.f32 %v1164_v13, %v1188_v20  ;;  %v1226_v51 = vsel %vm2973_vm5, %v1210_v55, 0.0  ;;  %v1130_v41 = vmul.f32 %v1114_v61, %v1114_v61 }
 0x2a2   : > { %v1194_v22 = vmul.f32 0.6931472, %v1762_v50  ;;  %v1241_v34 = vadd.f32 %v1240_v27, %v1226_v51  ;;  %v1144_v11 = vadd.f32 %v1128_v57, %v3257_v10  ;;  %v1167_v39 = vmul.f32 %v2847_v30, %v1142_v17 }
 0x2a3   : > { %v1213_v60 = vsub.f32 %v1165_v18, %v1190_v36  ;;  %v1227_v47 = vsel %vm2988_vm6, %v1211_v1, 0.0  ;;  %v1090_v50 = vmul.f32 %v2673_v25, %v2673_v25  ;;  %v1131_v56 = vmul.f32 %v1115_v62, %v1115_v62 }
 0x2a4   : > { %v1196_v49 = vmul.f32 0.6931472, %v2916_v8  ;;  %v1242_v0 = vadd.f32 %v1241_v34, %v1227_v47  ;;  %v1145_v37 = vadd.f32 %v1129_v58, %v3260_v5  ;;  %v1168_v35 = vmul.f32 %v2847_v30, %v1143_v7 }
 0x2a5   : > { %v1214_v14 = vsub.f32 %v1166_v2, %v1192_v26  ;;  %v1228_v21 = vsel %vm3005_vm8, %v1212_v3, 0.0  ;;  %vm1051_vm10 = vcmp.lt.s32.totalorder %v3261_v40, %v2829_v28  ;;  %v1198_v25 = vmul.f32 0.6931472, %v1766_v24 }
 0x2a6   : > { %v1243_v8 = vadd.f32 %v1242_v0, %v1228_v21  ;;  %v1146_v48 = vadd.f32 %v1130_v41, %v2841_v33  ;;  %v1169_v6 = vmul.f32 %v2847_v30, %v1144_v11  ;;  %v1215_v31 = vsub.f32 %v1167_v39, %v1194_v22  ;;  %vm1067_vm15 = vmand %vm1051_vm10, %vm2711_vm3 }
 0x2a7   : > { %v1229_v52 = vsel %vm3018_vm9, %v1213_v60, 0.0  ;;  %v1037_v20 = vadd.s32 112, %v2699_v44  ;;  %vm1052_vm12 = vcmp.lt.s32.totalorder %v3262_v42, %v2829_v28  ;;  %v1200_v59 = vmul.f32 0.6931472, %v1768_v9  ;;  %v3263_v60 = vld [vmem:[#allocation27_spill] sm:$0xff] }
 0x2a8   : > { %v1244_v24 = vadd.f32 %v1243_v8, %v1229_v52  ;;  %v1147_v33 = vadd.f32 %v1131_v56, %v1090_v50  ;;  %v1170_v54 = vmul.f32 %v2847_v30, %v1145_v37  ;;  %v1216_v13 = vsub.f32 %v1168_v35, %v1196_v49  ;;  %vm1068_vm1 = vmand %vm1052_vm12, %vm2711_vm3  ;;  %v3264_v56 = vld [vmem:[#allocation26_spill] sm:$0xff] }
 0x2a9   : > { %v1230_v55 = vsel %vm1065_vm11, %v1214_v14, 0.0  ;;  %v1038_v45 = vadd.s32 120, %v2699_v44  ;;  %v1171_v61 = vmul.f32 %v2847_v30, %v1146_v48  ;;  %v1202_v9 = vmul.f32 0.6931472, %v1770_v16 }
 0x2aa   : > { %v1245_v4 = vadd.f32 %v1244_v24, %v1230_v55  ;;  %v1217_v57 = vsub.f32 %v1169_v6, %v1198_v25  ;;  %v1231_v36 = vsel %vm1066_vm13, %v1215_v31, 0.0  ;;  %vm1054_vm0 = vcmp.lt.s32.totalorder %v1037_v20, %v2829_v28  ;;  %v1310_v25 = vld [vmem:[#allocation3] sm:$0x1] }
 0x2ab   : > { %v1172_v53 = vmul.f32 %v2847_v30, %v1147_v33  ;;  %v1204_v17 = vmul.f32 0.6931472, %v1772_v29  ;;  %v1218_v18 = vsub.f32 %v1170_v54, %v1200_v59  ;;  %v1232_v1 = vsel %vm1067_vm15, %v1216_v13, 0.0  ;;  %vm1070_vm5 = vmand %vm1054_vm0, %vm2711_vm3 }
 0x2ac   : > { %v1246_v44 = vadd.f32 %v1245_v4, %v1231_v36  ;;  %vm1055_vm4 = vcmp.lt.s32.totalorder %v1038_v45, %v2829_v28  ;;  %v1219_v38 = vsub.f32 %v1171_v61, %v1202_v9  ;;  %v1233_v32 = vsel %vm1068_vm1, %v1217_v57, 0.0 }
 0x2ad   : > { %v1220_v62 = vsub.f32 %v1172_v53, %v1204_v17  ;;  %v1234_v58 = vsel %vm1069_vm2, %v1218_v18, 0.0  ;;  %vm1071_vm6 = vmand %vm1055_vm4, %vm2711_vm3  ;;  %v1021_v47 = vmul.f32 0.5, %v3263_v60  ;;  %v1302_v50 = vstv %s1300_s23 }
 0x2ae   : > { %v1247_v16 = vadd.f32 %v1246_v44, %v1232_v1  ;;  %v1235_v26 = vsel %vm1070_vm5, %v1219_v38, 0.0  ;;  %v1305_v49 = vmul.f32 0.5, %v3264_v56  ;;  %vm1312_vm3 = vcmask 0  }
 0x2af   : > { %v1236_v23 = vsel %vm1071_vm6, %v1220_v62, 0.0  ;;  %v1531_v43 = vadd.f32 -0.5, %v1021_v47  ;;  %v1308_v12 = vmul.f32 %v1021_v47, %v3263_v60 }
 0x2b0   : > { %v1248_v46 = vadd.f32 %v1247_v16, %v1233_v32  ;;  %v1306_v14 = vmul.f32 %v1305_v49, %v3264_v56 }
 0x2b1   : > { %v1303_v5 = vmul.f32 %v1531_v43, %v1302_v50 }
 0x2b2   : > { %v1249_v30 = vadd.f32 %v1248_v46, %v1234_v58 }
 0x2b4   : > { %v1250_v27 = vadd.f32 %v1249_v30, %v1235_v26 }
 0x2b6   : > { %v1251_v7 = vadd.f32 %v1250_v27, %v1236_v23 }
 0x2b8   : > { %1252 = vadd.xlane.f32.xlu0 %v1251_v7 }
 0x326   : > { %v1290_v2 = vpop.xlane.xlu1 %1289 }
 0x327   : > { %v1291_v28 = vrot.slane %v1290_v2, 4 }
 0x329   : > { %v1292_v3 = vadd.f32 %v1291_v28, %v1290_v2 }
 0x32b   : > { %v1293_v51 = vrot.slane %v1292_v3, 2 }
 0x32d   : > { %v1294_v41 = vadd.f32 %v1293_v51, %v1292_v3 }
 0x32f   : > { %v1295_v34 = vrot.slane %v1294_v41, 1 }
 0x331   : > { %v1296_v39 = vadd.f32 %v1295_v34, %v1294_v41 }
 0x345   : > { %v1253_v29 = vpop.xlane.xlu0 %1252 }
 0x346   : > { %v1254_v19 = vrot.slane %v1253_v29, 4 }
 0x348   : > { %v1255_v63 = vadd.f32 %v1254_v19, %v1253_v29 }
 0x34a   : > { %v1256_v22 = vrot.slane %v1255_v63, 2 }
 0x34c   : > { %v1257_v15 = vadd.f32 %v1256_v22, %v1255_v63 }
 0x34e   : > { %v1258_v10 = vrot.slane %v1257_v15, 1 }
 0x350   : > { %v1259_v11 = vadd.f32 %v1258_v10, %v1257_v15 }
 0x352   : > { %1571 = vpush %v1259_v11 }
 0x353   : > { %1573 = vpush %v1296_v39 }
 0x383   : > { %s1572_s24 = spop %1571 }
 0x384   : > { %v1261_v0 = vstv %s1572_s24  ;;  %s1574_s30 = spop %1573 }
 0x385   : > { %v1298_v37 = vstv %s1574_s30 }
 0x386   : > { %v1299_v35 = vadd.f32 %v1298_v37, %v1261_v0 }
 0x388   : > { %v1304_v21 = vadd.f32 %v1303_v5, %v1299_v35 }
 0x38a   : > { %v1307_v40 = vadd.f32 %v1306_v14, %v1304_v21  ;;  %1316 = sbr.rel (%p1530_p13) target bundleno = 921 (0x399), region = 100 }
 0x38c   : > { %v1309_v8 = vadd.f32 %v1308_v12, %v1307_v40 }
 0x38e   : > { %v1311_v48 = vadd.f32 %v1310_v25, %v1309_v8 }
 0x390   : > { %1313 = vst.msk [vmem:[#allocation3] sm:$0x1] %vm1312_vm3, %v1311_v48 }
 0x397   : > { %v1317_v6 = vld [vmem:[#allocation3] sm:$0x1] }
 0x398   : > { %1318 = vst.msk [vmem:[#allocation15] sm:$0x1] %vm1312_vm3, %v1317_v6 }
 0x399 PF: > { %p1619_p12 = scmp.eq.s32.totalorder %s2164_s19, 2  ;;  %s2008_s18 = smov [#allocation14]  }
 0x39a   : > { %s1326_s9 = sshll.u32 %s2008_s18, 4  ;;  %s2009_s10 = smov [#allocation15]   ;;  %s1327_s9 = int_to_ptr.vmem [resolvable:$true] %s1326_s9 }
 0x39b   : > { %s1337_s29 = sshll.u32 %s2009_s10, 4  ;;  %s1889_s14 = scalar_lea.vmem %s1327_s9, 128  ;;  %s1338_s29 = int_to_ptr.vmem [resolvable:$true] %s1337_s29 }
 0x39c   : > { %p1890_p2 = scmp.ne.s32.totalorder %s1327_s9, %s1889_s14  ;;  %p1896_p7 = scmp.lt.s32.totalorder %s1327_s9, %s1327_s9 }
 0x39d   : > { %p1897_p3 = scmp.lt.s32.totalorder %s1889_s14, %s1889_s14 }
 0x39e   : > { %p1891_p6 = pnand %p1890_p2, %p1619_p12 }
 0x39f   : > { %p1898_p0 = por %p1897_p3, %p1896_p7 }
 0x3a0   : > { %p1892_p11 = pneg %p1891_p6 }
 0x3a2   : > { %p1899_p1 = pnand %p1898_p0, %p1892_p11 }
 0x3a4   : > { %1902 = shalt.err (!%p1899_p1)
}
 0x3a5   : > { %s3265_s4 = sld [smem:[#allocation40_spill]] }
 0x3ab   : > { %s1903_s11 = scalar_lea.hbm %s3265_s4, 128 }
 0x3ac   : > { %p1904_p4 = scmp.ne.s32.totalorder %s3265_s4, %s1903_s11  ;;  %p1909_p10 = scmp.lt.u32.totalorder %s1903_s11, %s3265_s4 }
 0x3ae   : > { %p1905_p5 = pnand %p1904_p4, %p1619_p12 }
 0x3b0   : > { %p1906_p8 = pneg %p1905_p5 }
 0x3b2   : > { %p1911_p9 = pnand %p1909_p10, %p1906_p8 }
 0x3b4   : > { %1914 = shalt.err (!%p1911_p9)
}
 0x3b5   : > { %1590 = dma.vmem_to_hbm [thread:$0]  (%p1619_p12), %s1327_s9, 128, %s3265_s4, [#allocation6]  }
 0x3b6   : > { %s1915_s25 = scalar_lea.vmem %s1338_s29, 16  ;;  %s1921_s17 = scalar_lea.vmem %s1338_s29, 32 }
 0x3b7   : > { %p1916_p13 = scmp.ne.s32.totalorder %s1338_s29, %s1915_s25  ;;  %p1922_p11 = scmp.lt.s32.totalorder %s1338_s29, %s1338_s29 }
 0x3b8   : > { %p1923_p7 = scmp.lt.s32.totalorder %s1921_s17, %s1915_s25 }
 0x3b9   : > { %p1917_p2 = pnand %p1916_p13, %p1619_p12 }
 0x3ba   : > { %p1924_p3 = por %p1923_p7, %p1922_p11 }
 0x3bb   : > { %p1918_p6 = pneg %p1917_p2 }
 0x3bd   : > { %p1925_p0 = pnand %p1924_p3, %p1918_p6 }
 0x3bf   : > { %1928 = shalt.err (!%p1925_p0)
}
 0x3c0   : > { %s3266_s2 = sld [smem:[#allocation41_spill]] }
 0x3c6   : > { %s1929_s23 = scalar_lea.hbm %s3266_s2, 16 }
 0x3c7   : > { %p1930_p1 = scmp.ne.s32.totalorder %s3266_s2, %s1929_s23  ;;  %p1935_p8 = scmp.lt.u32.totalorder %s1929_s23, %s3266_s2 }
 0x3c9   : > { %p1931_p4 = pnand %p1930_p1, %p1619_p12 }
 0x3cb   : > { %p1932_p5 = pneg %p1931_p4 }
 0x3cd   : > { %p1937_p10 = pnand %p1935_p8, %p1932_p5 }
 0x3cf   : > { %1940 = shalt.err (!%p1937_p10)
}
 0x3d0   : > { %1592 = dma.vmem_to_hbm [thread:$0]  (%p1619_p12), %s1338_s29, 16, %s3266_s2, [#allocation16]  }
 0x3d1   : > { %1974 = dma.done.wait (%p1619_p12), [#allocation6], 128  }
 0x3d2   : > { %1976 = vsyncadd (%p1619_p12), [#allocation6], 4294967168 }
 0x3d3   : > { %1978 = dma.done.wait (%p1619_p12), [#allocation16], 16  }
 0x3d4   : > { %1980 = vsyncadd (%p1619_p12), [#allocation16], 4294967280 }
 0x3d5 PF: > { %s3267_s24 = sld [smem:[#allocation24_spill]]  ;;  %s3268_s3 = sld [smem:[#allocation23_spill]] }
 0x3d6   : > { %s3269_s23 = sld [smem:[#allocation25_spill]]  ;;  %s3270_s21 = smov %s1987_s22 }
 0x3db   : > { %p30_p9 = scmp.ge.s32.totalorder %s3267_s24, 5   ;;  %s3271_s22 = smov %s3268_s3 }
 0x3dd   :  { %32 = sbr.rel (!%p30_p9) target bundleno = 17 (0x11), region = 173 }
 0x3e4   :  { %1354 = vsyncpa [#allocation5], 1 }
 0x3e5   :  { %1356 = vsyncpa [#allocation5 + $0x1], 1 }
 0x3e6   :  { %1357 = vsyncpa [#allocation12], 1 }
 0x3e7   :  { %1359 = vsyncpa [#allocation12 + $0x1], 1 }
 0x3e8   :  { %1360 = vsyncpa [#allocation6], 1 }
 0x3e9   :  { %1362 = vsyncpa [#allocation6 + $0x1], 1 }
 0x3ea   :  { %1363 = vsyncpa [#allocation16], 1 }
 0x3eb   :  { %1364 = vsyncpa [#allocation7], 1 }
 0x3ec   :  { %1366 = vsyncpa [#allocation7 + $0x1], 1 }
 0x3ed   :  { %1367 = vsyncpa [#allocation9], 1 }

</bundles_post_ra>
